<compile_context>
chip_gen: v6e
topology: v6e:2x2x1
jax: 0.10.0
libtpu: 0.0.40
codegen_flags: <defaults>
</compile_context>

<pallas_src>
import functools

import jax
import jax.numpy as jnp
from jax.experimental import pallas as pl
from jax.experimental.pallas import tpu as pltpu


# ----------------------------------------------------------------------------
# Pallas kernel 1: transposed matmul + bias + optional ReLU
#     out(N, M) = act( W(N, K) @ X(K, M) + b(N, 1) )
# ----------------------------------------------------------------------------
def _wx_bias_act_kernel(w_ref, x_ref, b_ref, o_ref, *, relu):
    acc = jnp.dot(w_ref[...], x_ref[...], preferred_element_type=jnp.float32)
    acc = acc + b_ref[...]            # (N, 1) broadcasts across the lane (M) axis
    if relu:
        acc = jnp.maximum(acc, 0.0)
    o_ref[...] = acc.astype(o_ref.dtype)


def _pick_tile_m(M):
    for t in (512, 256, 128):
        if M % t == 0:
            return t
    return M


def matmul_t_bias_act(w, x, b, *, relu, out_dtype=jnp.float32):
    """act(w @ x + b).  w:(N,K) bf16, x:(K,M) bf16, b:(N,1) f32 -> (N,M)."""
    N, K = w.shape
    K2, M = x.shape
    assert K == K2, (K, K2)
    tm = _pick_tile_m(M)
    bytes_accessed = (w.size * w.dtype.itemsize + x.size * x.dtype.itemsize
                      + b.size * 4 + N * M * jnp.dtype(out_dtype).itemsize)
    return pl.pallas_call(
        functools.partial(_wx_bias_act_kernel, relu=relu),
        out_shape=jax.ShapeDtypeStruct((N, M), out_dtype),
        grid=(M // tm,),
        in_specs=[
            pl.BlockSpec((N, K), lambda i: (0, 0)),    # weights pinned in VMEM
            pl.BlockSpec((K, tm), lambda i: (0, i)),   # stream M tiles (pipelined)
            pl.BlockSpec((N, 1), lambda i: (0, 0)),    # bias pinned
        ],
        out_specs=pl.BlockSpec((N, tm), lambda i: (0, i)),
        compiler_params=pltpu.CompilerParams(
            dimension_semantics=("parallel",)),        # megacore on v7x
        cost_estimate=pl.CostEstimate(flops=2 * N * K * M, transcendentals=0,
                                      bytes_accessed=bytes_accessed),
    )(w, x, b)


# ----------------------------------------------------------------------------
# Pallas kernel 2: fused fc + fc_mean/fc_logvar heads.
#     y = relu(x @ Wfc + bfc) @ Wheads + bheads   (hidden stays in VMEM)
# ----------------------------------------------------------------------------
def _fc_heads_kernel(x_ref, wfc_ref, bfc_ref, wh_ref, bh_ref, o_ref):
    h = jnp.dot(x_ref[...], wfc_ref[...], preferred_element_type=jnp.float32)
    h = jnp.maximum(h + bfc_ref[...], 0.0)
    y = jnp.dot(h.astype(wh_ref.dtype), wh_ref[...],
                preferred_element_type=jnp.float32)
    o_ref[...] = (y + bh_ref[...]).astype(o_ref.dtype)


def fused_fc_heads(flat, w_fc, b_fc, w_heads, b_heads):
    B, K = flat.shape
    K2, H = w_fc.shape
    H2, N2 = w_heads.shape
    assert K == K2 and H == H2
    return pl.pallas_call(
        _fc_heads_kernel,
        out_shape=jax.ShapeDtypeStruct((B, N2), jnp.float32),
        grid=(1,),
        in_specs=[
            pl.BlockSpec((B, K), lambda i: (0, 0)),
            pl.BlockSpec((K, H), lambda i: (0, 0)),
            pl.BlockSpec((1, H), lambda i: (0, 0)),
            pl.BlockSpec((H, N2), lambda i: (0, 0)),
            pl.BlockSpec((1, N2), lambda i: (0, 0)),
        ],
        out_specs=pl.BlockSpec((B, N2), lambda i: (0, 0)),
    )(flat, w_fc, b_fc, w_heads, b_heads)


# ----------------------------------------------------------------------------
# Conv2d(k=4, s=2, p=1) + ReLU on channel-major activations.
# ----------------------------------------------------------------------------
def conv2d_relu_cm(x_cm, w2, b_col):
    """x_cm:(Cin,B,H,W) bf16, w2:(Cout,Cin*16) bf16, b_col:(Cout,1) f32
       -> (Cout, B, H//2, W//2) bf16."""
    C, B, H, W = x_cm.shape
    Cout = w2.shape[0]
    k, s, p = 4, 2, 1
    Ho = (H + 2 * p - k) // s + 1
    Wo = (W + 2 * p - k) // s + 1

    # TODO(synk): im2col window extraction is plain-XLA strided slicing; a
    # fully in-kernel conv with overlapping-window BlockSpecs would avoid
    # materializing `col`, but the transpose-free channel-major build below
    # already keeps it a single contiguous bf16 stack+reshape.
    xp = jnp.pad(x_cm, ((0, 0), (0, 0), (p, p), (p, p)))
    cols = []
    for kh in range(k):
        for kw in range(k):
            cols.append(xp[:, :, kh:kh + s * (Ho - 1) + 1:s,
                              kw:kw + s * (Wo - 1) + 1:s])
    # (Cin, k*k, B, Ho, Wo); K index (c, kh, kw) matches torch weight.reshape.
    col = jnp.stack(cols, axis=1).reshape(C * k * k, B * Ho * Wo)
    out_t = matmul_t_bias_act(w2, col, b_col, relu=True, out_dtype=jnp.bfloat16)
    return out_t.reshape(Cout, B, Ho, Wo)


# ----------------------------------------------------------------------------
# Parameter init (PyTorch-default-style uniform bounds, PyTorch layouts).
# ----------------------------------------------------------------------------
def init_params(key, in_channels, n_latents):
    def conv_init(key, cout, cin, ksz):
        fan_in = cin * ksz * ksz
        bound = 1.0 / (fan_in ** 0.5)
        kw_, kb_ = jax.random.split(key)
        w = jax.random.uniform(kw_, (cout, cin, ksz, ksz), jnp.float32, -bound, bound)
        b = jax.random.uniform(kb_, (cout,), jnp.float32, -bound, bound)
        return w, b

    def linear_init(key, cin, cout):
        bound = 1.0 / (cin ** 0.5)
        kw_, kb_ = jax.random.split(key)
        w = jax.random.uniform(kw_, (cout, cin), jnp.float32, -bound, bound)
        b = jax.random.uniform(kb_, (cout,), jnp.float32, -bound, bound)
        return w, b

    ks = jax.random.split(key, 7)
    return {
        "conv1": conv_init(ks[0], 32, in_channels, 4),
        "conv2": conv_init(ks[1], 32, 32, 4),
        "conv3": conv_init(ks[2], 64, 32, 4),
        "conv4": conv_init(ks[3], 64, 64, 4),
        "fc": linear_init(ks[4], 1024, 256),
        "fc_mean": linear_init(ks[5], 256, n_latents),
        "fc_logvar": linear_init(ks[6], 256, n_latents),
    }


def prepare_params(params):
    """One-time (outside jit) reshape / transpose / bf16 cast of weights."""
    prepared = {}
    for name in ("conv1", "conv2", "conv3", "conv4"):
        w, b = params[name]
        cout = w.shape[0]
        prepared[name] = (w.reshape(cout, -1).astype(jnp.bfloat16),   # (Cout, Cin*16)
                          b.reshape(cout, 1).astype(jnp.float32))     # (Cout, 1)
    w_fc, b_fc = params["fc"]
    prepared["fc"] = (w_fc.T.astype(jnp.bfloat16),                    # (1024, 256)
                      b_fc.reshape(1, -1).astype(jnp.float32))        # (1, 256)
    w_m, b_m = params["fc_mean"]
    w_v, b_v = params["fc_logvar"]
    prepared["heads"] = (
        jnp.concatenate([w_m.T, w_v.T], axis=1).astype(jnp.bfloat16),      # (256, 2L)
        jnp.concatenate([b_m, b_v]).reshape(1, -1).astype(jnp.float32),    # (1, 2L)
    )
    return prepared


# ----------------------------------------------------------------------------
# Full forward pass (matches ConvEncoder.forward).
# ----------------------------------------------------------------------------
def conv_encoder_forward(pparams, x):
    # Channel-major (C, B, H, W) activations: the transposed matmul writes this
    # layout directly, so no per-layer NCHW transpose is needed.
    out = x.astype(jnp.bfloat16).transpose(1, 0, 2, 3)
    out = conv2d_relu_cm(out, *pparams["conv1"])   # (32, B, 32, 32)
    out = conv2d_relu_cm(out, *pparams["conv2"])   # (32, B, 16, 16)
    out = conv2d_relu_cm(out, *pparams["conv3"])   # (64, B, 8, 8)
    out = conv2d_relu_cm(out, *pparams["conv4"])   # (64, B, 4, 4)
    B = out.shape[1]
    # Final flatten in torch NCHW element order (tiny transpose: B*1024 elems).
    flat = out.transpose(1, 0, 2, 3).reshape(B, 1024)
    w_fc, b_fc = pparams["fc"]
    w_h, b_h = pparams["heads"]
    y = fused_fc_heads(flat, w_fc, b_fc, w_h, b_h)     # (B, 2*n_latents) f32
    L = w_h.shape[1] // 2
    return y[:, :L], y[:, L:]


if __name__ == "__main__":
    in_channels = 3
    n_latents = 8
    batch = 2
    # Spatial size must be 64x64 so conv4 output flattens to 1024 (= 64*4*4),
    # exactly as the module's fc layer requires.
    key = jax.random.PRNGKey(0)
    k_params, k_x = jax.random.split(key)
    params = init_params(k_params, in_channels, n_latents)
    pparams = prepare_params(params)     # weight reshapes/transposes done once
    x = jax.random.normal(k_x, (batch, in_channels, 64, 64), dtype=jnp.float32)

    fwd = jax.jit(conv_encoder_forward)
    mean, logvar = fwd(pparams, x)
    jax.block_until_ready((mean, logvar))

    assert mean.shape == (batch, n_latents), mean.shape
    assert logvar.shape == (batch, n_latents), logvar.shape
    assert bool(jnp.isfinite(mean).all()) and bool(jnp.isfinite(logvar).all())
    print("KERNEL_OK")
</pallas_src>

<mosaic_0001>
module attributes {stable_mosaic.version = 11 : i64} {
  func.func @_wx_bias_act_kernel(%arg0: i32, %arg1: memref<32x48xbf16, #tpu.memory_space<vmem>>, %arg2: memref<48x512xbf16, #tpu.memory_space<vmem>>, %arg3: memref<32x1xf32, #tpu.memory_space<vmem>>, %arg4: memref<32x512xbf16, #tpu.memory_space<vmem>>) attributes {dimension_semantics = [#tpu.dimension_semantics<parallel>], iteration_bounds = array<i64: 4>, scalar_prefetch = 0 : i64, scratch_operands = 0 : i64, tpu.core_type = #tpu.core_type<tc>, window_params = [{pipeline_mode = #tpu.pipeline_mode<synchronous>, transform_indices = @transform_0, window_bounds = array<i64: 32, 48>}, {transform_indices = @transform_1, window_bounds = array<i64: 48, 512>}, {pipeline_mode = #tpu.pipeline_mode<synchronous>, transform_indices = @transform_2, window_bounds = array<i64: 32, 1>}, {transform_indices = @transform_3, window_bounds = array<i64: 32, 512>}]} {
    %c0 = arith.constant 0 : index
    %c0_0 = arith.constant 0 : index
    %0 = vector.load %arg1[%c0, %c0_0] : memref<32x48xbf16, #tpu.memory_space<vmem>>, vector<32x48xbf16>
    %c0_1 = arith.constant 0 : index
    %c0_2 = arith.constant 0 : index
    %1 = vector.load %arg2[%c0_1, %c0_2] : memref<48x512xbf16, #tpu.memory_space<vmem>>, vector<48x512xbf16>
    %cst = arith.constant dense<0.000000e+00> : vector<32x512xf32>
    %2 = tpu.matmul %0, %1, %cst {dimension_numbers = #tpu.dot_dimension_numbers<[1], [0], [0], [1], [0, 0, 1, 1], [], []>} : vector<32x48xbf16>, vector<48x512xbf16>, vector<32x512xf32> -> vector<32x512xf32>
    %c0_3 = arith.constant 0 : index
    %c0_4 = arith.constant 0 : index
    %3 = vector.load %arg3[%c0_3, %c0_4] : memref<32x1xf32, #tpu.memory_space<vmem>>, vector<32x1xf32>
    %4 = vector.broadcast %3 : vector<32x1xf32> to vector<32x512xf32>
    %5 = arith.addf %2, %4 : vector<32x512xf32>
    %cst_5 = arith.constant 0.000000e+00 : f32
    %6 = vector.broadcast %cst_5 : f32 to vector<32x512xf32>
    %7 = arith.maximumf %5, %6 : vector<32x512xf32>
    %8 = arith.truncf %7 : vector<32x512xf32> to vector<32x512xbf16>
    %c0_6 = arith.constant 0 : index
    %c0_7 = arith.constant 0 : index
    %9 = vector.load %arg4[%c0_6, %c0_7] : memref<32x512xbf16, #tpu.memory_space<vmem>>, vector<32x512xbf16>
    tpu.vector_store %arg4[%c0_6, %c0_7], %8 {strides = array<i32>} : memref<32x512xbf16, #tpu.memory_space<vmem>>, vector<32x512xbf16>,
    return
  }
  func.func @transform_0(%arg0: i32) -> (i32, i32) {
    %c0_i32 = arith.constant 0 : i32
    %c0_i32_0 = arith.constant 0 : i32
    %c0_i32_1 = arith.constant 0 : i32
    return %c0_i32, %c0_i32_0 : i32, i32
  }
  func.func @transform_1(%arg0: i32) -> (i32, i32) {
    %c0_i32 = arith.constant 0 : i32
    %c0_i32_0 = arith.constant 0 : i32
    return %c0_i32, %arg0 : i32, i32
  }
  func.func @transform_2(%arg0: i32) -> (i32, i32) {
    %c0_i32 = arith.constant 0 : i32
    %c0_i32_0 = arith.constant 0 : i32
    %c0_i32_1 = arith.constant 0 : i32
    return %c0_i32, %c0_i32_0 : i32, i32
  }
  func.func @transform_3(%arg0: i32) -> (i32, i32) {
    %c0_i32 = arith.constant 0 : i32
    %c0_i32_0 = arith.constant 0 : i32
    return %c0_i32, %arg0 : i32, i32
  }
}

module attributes {stable_mosaic.version = 11 : i64} {
  func.func @_wx_bias_act_kernel(%arg0: i32, %arg1: memref<32x512xbf16, #tpu.memory_space<vmem>>, %arg2: memref<512x512xbf16, #tpu.memory_space<vmem>>, %arg3: memref<32x1xf32, #tpu.memory_space<vmem>>, %arg4: memref<32x512xbf16, #tpu.memory_space<vmem>>) attributes {dimension_semantics = [#tpu.dimension_semantics<parallel>], iteration_bounds = array<i64: 1>, scalar_prefetch = 0 : i64, scratch_operands = 0 : i64, tpu.core_type = #tpu.core_type<tc>, window_params = [{pipeline_mode = #tpu.pipeline_mode<synchronous>, transform_indices = @transform_0, window_bounds = array<i64: 32, 512>}, {transform_indices = @transform_1, window_bounds = array<i64: 512, 512>}, {pipeline_mode = #tpu.pipeline_mode<synchronous>, transform_indices = @transform_2, window_bounds = array<i64: 32, 1>}, {transform_indices = @transform_3, window_bounds = array<i64: 32, 512>}]} {
    %c0 = arith.constant 0 : index
    %c0_0 = arith.constant 0 : index
    %0 = vector.load %arg1[%c0, %c0_0] : memref<32x512xbf16, #tpu.memory_space<vmem>>, vector<32x512xbf16>
    %c0_1 = arith.constant 0 : index
    %c0_2 = arith.constant 0 : index
    %1 = vector.load %arg2[%c0_1, %c0_2] : memref<512x512xbf16, #tpu.memory_space<vmem>>, vector<512x512xbf16>
    %cst = arith.constant dense<0.000000e+00> : vector<32x512xf32>
    %2 = tpu.matmul %0, %1, %cst {dimension_numbers = #tpu.dot_dimension_numbers<[1], [0], [0], [1], [0, 0, 1, 1], [], []>} : vector<32x512xbf16>, vector<512x512xbf16>, vector<32x512xf32> -> vector<32x512xf32>
    %c0_3 = arith.constant 0 : index
    %c0_4 = arith.constant 0 : index
    %3 = vector.load %arg3[%c0_3, %c0_4] : memref<32x1xf32, #tpu.memory_space<vmem>>, vector<32x1xf32>
    %4 = vector.broadcast %3 : vector<32x1xf32> to vector<32x512xf32>
    %5 = arith.addf %2, %4 : vector<32x512xf32>
    %cst_5 = arith.constant 0.000000e+00 : f32
    %6 = vector.broadcast %cst_5 : f32 to vector<32x512xf32>
    %7 = arith.maximumf %5, %6 : vector<32x512xf32>
    %8 = arith.truncf %7 : vector<32x512xf32> to vector<32x512xbf16>
    %c0_6 = arith.constant 0 : index
    %c0_7 = arith.constant 0 : index
    %9 = vector.load %arg4[%c0_6, %c0_7] : memref<32x512xbf16, #tpu.memory_space<vmem>>, vector<32x512xbf16>
    tpu.vector_store %arg4[%c0_6, %c0_7], %8 {strides = array<i32>} : memref<32x512xbf16, #tpu.memory_space<vmem>>, vector<32x512xbf16>,
    return
  }
  func.func @transform_0(%arg0: i32) -> (i32, i32) {
    %c0_i32 = arith.constant 0 : i32
    %c0_i32_0 = arith.constant 0 : i32
    %c0_i32_1 = arith.constant 0 : i32
    return %c0_i32, %c0_i32_0 : i32, i32
  }
  func.func @transform_1(%arg0: i32) -> (i32, i32) {
    %c0_i32 = arith.constant 0 : i32
    %c0_i32_0 = arith.constant 0 : i32
    return %c0_i32, %arg0 : i32, i32
  }
  func.func @transform_2(%arg0: i32) -> (i32, i32) {
    %c0_i32 = arith.constant 0 : i32
    %c0_i32_0 = arith.constant 0 : i32
    %c0_i32_1 = arith.constant 0 : i32
    return %c0_i32, %c0_i32_0 : i32, i32
  }
  func.func @transform_3(%arg0: i32) -> (i32, i32) {
    %c0_i32 = arith.constant 0 : i32
    %c0_i32_0 = arith.constant 0 : i32
    return %c0_i32, %arg0 : i32, i32
  }
}

module attributes {stable_mosaic.version = 11 : i64} {
  func.func @_wx_bias_act_kernel(%arg0: i32, %arg1: memref<64x512xbf16, #tpu.memory_space<vmem>>, %arg2: memref<512x128xbf16, #tpu.memory_space<vmem>>, %arg3: memref<64x1xf32, #tpu.memory_space<vmem>>, %arg4: memref<64x128xbf16, #tpu.memory_space<vmem>>) attributes {dimension_semantics = [#tpu.dimension_semantics<parallel>], iteration_bounds = array<i64: 1>, scalar_prefetch = 0 : i64, scratch_operands = 0 : i64, tpu.core_type = #tpu.core_type<tc>, window_params = [{pipeline_mode = #tpu.pipeline_mode<synchronous>, transform_indices = @transform_0, window_bounds = array<i64: 64, 512>}, {transform_indices = @transform_1, window_bounds = array<i64: 512, 128>}, {pipeline_mode = #tpu.pipeline_mode<synchronous>, transform_indices = @transform_2, window_bounds = array<i64: 64, 1>}, {transform_indices = @transform_3, window_bounds = array<i64: 64, 128>}]} {
    %c0 = arith.constant 0 : index
    %c0_0 = arith.constant 0 : index
    %0 = vector.load %arg1[%c0, %c0_0] : memref<64x512xbf16, #tpu.memory_space<vmem>>, vector<64x512xbf16>
    %c0_1 = arith.constant 0 : index
    %c0_2 = arith.constant 0 : index
    %1 = vector.load %arg2[%c0_1, %c0_2] : memref<512x128xbf16, #tpu.memory_space<vmem>>, vector<512x128xbf16>
    %cst = arith.constant dense<0.000000e+00> : vector<64x128xf32>
    %2 = tpu.matmul %0, %1, %cst {dimension_numbers = #tpu.dot_dimension_numbers<[1], [0], [0], [1], [0, 0, 1, 1], [], []>} : vector<64x512xbf16>, vector<512x128xbf16>, vector<64x128xf32> -> vector<64x128xf32>
    %c0_3 = arith.constant 0 : index
    %c0_4 = arith.constant 0 : index
    %3 = vector.load %arg3[%c0_3, %c0_4] : memref<64x1xf32, #tpu.memory_space<vmem>>, vector<64x1xf32>
    %4 = vector.broadcast %3 : vector<64x1xf32> to vector<64x128xf32>
    %5 = arith.addf %2, %4 : vector<64x128xf32>
    %cst_5 = arith.constant 0.000000e+00 : f32
    %6 = vector.broadcast %cst_5 : f32 to vector<64x128xf32>
    %7 = arith.maximumf %5, %6 : vector<64x128xf32>
    %8 = arith.truncf %7 : vector<64x128xf32> to vector<64x128xbf16>
    %c0_6 = arith.constant 0 : index
    %c0_7 = arith.constant 0 : index
    %9 = vector.load %arg4[%c0_6, %c0_7] : memref<64x128xbf16, #tpu.memory_space<vmem>>, vector<64x128xbf16>
    tpu.vector_store %arg4[%c0_6, %c0_7], %8 {strides = array<i32>} : memref<64x128xbf16, #tpu.memory_space<vmem>>, vector<64x128xbf16>,
    return
  }
  func.func @transform_0(%arg0: i32) -> (i32, i32) {
    %c0_i32 = arith.constant 0 : i32
    %c0_i32_0 = arith.constant 0 : i32
    %c0_i32_1 = arith.constant 0 : i32
    return %c0_i32, %c0_i32_0 : i32, i32
  }
  func.func @transform_1(%arg0: i32) -> (i32, i32) {
    %c0_i32 = arith.constant 0 : i32
    %c0_i32_0 = arith.constant 0 : i32
    return %c0_i32, %arg0 : i32, i32
  }
  func.func @transform_2(%arg0: i32) -> (i32, i32) {
    %c0_i32 = arith.constant 0 : i32
    %c0_i32_0 = arith.constant 0 : i32
    %c0_i32_1 = arith.constant 0 : i32
    return %c0_i32, %c0_i32_0 : i32, i32
  }
  func.func @transform_3(%arg0: i32) -> (i32, i32) {
    %c0_i32 = arith.constant 0 : i32
    %c0_i32_0 = arith.constant 0 : i32
    return %c0_i32, %arg0 : i32, i32
  }
}

module attributes {stable_mosaic.version = 11 : i64} {
  func.func @_wx_bias_act_kernel(%arg0: i32, %arg1: memref<64x1024xbf16, #tpu.memory_space<vmem>>, %arg2: memref<1024x32xbf16, #tpu.memory_space<vmem>>, %arg3: memref<64x1xf32, #tpu.memory_space<vmem>>, %arg4: memref<64x32xbf16, #tpu.memory_space<vmem>>) attributes {dimension_semantics = [#tpu.dimension_semantics<parallel>], iteration_bounds = array<i64: 1>, scalar_prefetch = 0 : i64, scratch_operands = 0 : i64, tpu.core_type = #tpu.core_type<tc>, window_params = [{pipeline_mode = #tpu.pipeline_mode<synchronous>, transform_indices = @transform_0, window_bounds = array<i64: 64, 1024>}, {transform_indices = @transform_1, window_bounds = array<i64: 1024, 32>}, {pipeline_mode = #tpu.pipeline_mode<synchronous>, transform_indices = @transform_2, window_bounds = array<i64: 64, 1>}, {transform_indices = @transform_3, window_bounds = array<i64: 64, 32>}]} {
    %c0 = arith.constant 0 : index
    %c0_0 = arith.constant 0 : index
    %0 = vector.load %arg1[%c0, %c0_0] : memref<64x1024xbf16, #tpu.memory_space<vmem>>, vector<64x1024xbf16>
    %c0_1 = arith.constant 0 : index
    %c0_2 = arith.constant 0 : index
    %1 = vector.load %arg2[%c0_1, %c0_2] : memref<1024x32xbf16, #tpu.memory_space<vmem>>, vector<1024x32xbf16>
    %cst = arith.constant dense<0.000000e+00> : vector<64x32xf32>
    %2 = tpu.matmul %0, %1, %cst {dimension_numbers = #tpu.dot_dimension_numbers<[1], [0], [0], [1], [0, 0, 1, 1], [], []>} : vector<64x1024xbf16>, vector<1024x32xbf16>, vector<64x32xf32> -> vector<64x32xf32>
    %c0_3 = arith.constant 0 : index
    %c0_4 = arith.constant 0 : index
    %3 = vector.load %arg3[%c0_3, %c0_4] : memref<64x1xf32, #tpu.memory_space<vmem>>, vector<64x1xf32>
    %4 = vector.broadcast %3 : vector<64x1xf32> to vector<64x32xf32>
    %5 = arith.addf %2, %4 : vector<64x32xf32>
    %cst_5 = arith.constant 0.000000e+00 : f32
    %6 = vector.broadcast %cst_5 : f32 to vector<64x32xf32>
    %7 = arith.maximumf %5, %6 : vector<64x32xf32>
    %8 = arith.truncf %7 : vector<64x32xf32> to vector<64x32xbf16>
    %c0_6 = arith.constant 0 : index
    %c0_7 = arith.constant 0 : index
    %9 = vector.load %arg4[%c0_6, %c0_7] : memref<64x32xbf16, #tpu.memory_space<vmem>>, vector<64x32xbf16>
    tpu.vector_store %arg4[%c0_6, %c0_7], %8 {strides = array<i32>} : memref<64x32xbf16, #tpu.memory_space<vmem>>, vector<64x32xbf16>,
    return
  }
  func.func @transform_0(%arg0: i32) -> (i32, i32) {
    %c0_i32 = arith.constant 0 : i32
    %c0_i32_0 = arith.constant 0 : i32
    %c0_i32_1 = arith.constant 0 : i32
    return %c0_i32, %c0_i32_0 : i32, i32
  }
  func.func @transform_1(%arg0: i32) -> (i32, i32) {
    %c0_i32 = arith.constant 0 : i32
    %c0_i32_0 = arith.constant 0 : i32
    return %c0_i32, %arg0 : i32, i32
  }
  func.func @transform_2(%arg0: i32) -> (i32, i32) {
    %c0_i32 = arith.constant 0 : i32
    %c0_i32_0 = arith.constant 0 : i32
    %c0_i32_1 = arith.constant 0 : i32
    return %c0_i32, %c0_i32_0 : i32, i32
  }
  func.func @transform_3(%arg0: i32) -> (i32, i32) {
    %c0_i32 = arith.constant 0 : i32
    %c0_i32_0 = arith.constant 0 : i32
    return %c0_i32, %arg0 : i32, i32
  }
}

module attributes {stable_mosaic.version = 11 : i64} {
  func.func @_fc_heads_kernel(%arg0: i32, %arg1: memref<2x1024xbf16, #tpu.memory_space<vmem>>, %arg2: memref<1024x256xbf16, #tpu.memory_space<vmem>>, %arg3: memref<1x256xf32, #tpu.memory_space<vmem>>, %arg4: memref<256x16xbf16, #tpu.memory_space<vmem>>, %arg5: memref<1x16xf32, #tpu.memory_space<vmem>>, %arg6: memref<2x16xf32, #tpu.memory_space<vmem>>) attributes {dimension_semantics = [#tpu.dimension_semantics<arbitrary>], iteration_bounds = array<i64: 1>, scalar_prefetch = 0 : i64, scratch_operands = 0 : i64, tpu.core_type = #tpu.core_type<tc>, window_params = [{pipeline_mode = #tpu.pipeline_mode<synchronous>, transform_indices = @transform_0, window_bounds = array<i64: 2, 1024>}, {pipeline_mode = #tpu.pipeline_mode<synchronous>, transform_indices = @transform_1, window_bounds = array<i64: 1024, 256>}, {pipeline_mode = #tpu.pipeline_mode<synchronous>, transform_indices = @transform_2, window_bounds = array<i64: 1, 256>}, {pipeline_mode = #tpu.pipeline_mode<synchronous>, transform_indices = @transform_3, window_bounds = array<i64: 256, 16>}, {pipeline_mode = #tpu.pipeline_mode<synchronous>, transform_indices = @transform_4, window_bounds = array<i64: 1, 16>}, {pipeline_mode = #tpu.pipeline_mode<synchronous>, transform_indices = @transform_5, window_bounds = array<i64: 2, 16>}]} {
    %c0 = arith.constant 0 : index
    %c0_0 = arith.constant 0 : index
    %0 = vector.load %arg1[%c0, %c0_0] : memref<2x1024xbf16, #tpu.memory_space<vmem>>, vector<2x1024xbf16>
    %c0_1 = arith.constant 0 : index
    %c0_2 = arith.constant 0 : index
    %1 = vector.load %arg2[%c0_1, %c0_2] : memref<1024x256xbf16, #tpu.memory_space<vmem>>, vector<1024x256xbf16>
    %cst = arith.constant dense<0.000000e+00> : vector<2x256xf32>
    %2 = tpu.matmul %0, %1, %cst {dimension_numbers = #tpu.dot_dimension_numbers<[1], [0], [0], [1], [0, 0, 1, 1], [], []>} : vector<2x1024xbf16>, vector<1024x256xbf16>, vector<2x256xf32> -> vector<2x256xf32>
    %c0_3 = arith.constant 0 : index
    %c0_4 = arith.constant 0 : index
    %3 = vector.load %arg3[%c0_3, %c0_4] : memref<1x256xf32, #tpu.memory_space<vmem>>, vector<1x256xf32>
    %4 = vector.broadcast %3 : vector<1x256xf32> to vector<2x256xf32>
    %5 = arith.addf %2, %4 : vector<2x256xf32>
    %cst_5 = arith.constant 0.000000e+00 : f32
    %6 = vector.broadcast %cst_5 : f32 to vector<2x256xf32>
    %7 = arith.maximumf %5, %6 : vector<2x256xf32>
    %8 = arith.truncf %7 : vector<2x256xf32> to vector<2x256xbf16>
    %c0_6 = arith.constant 0 : index
    %c0_7 = arith.constant 0 : index
    %9 = vector.load %arg4[%c0_6, %c0_7] : memref<256x16xbf16, #tpu.memory_space<vmem>>, vector<256x16xbf16>
    %cst_8 = arith.constant dense<0.000000e+00> : vector<2x16xf32>
    %10 = tpu.matmul %8, %9, %cst_8 {dimension_numbers = #tpu.dot_dimension_numbers<[1], [0], [0], [1], [0, 0, 1, 1], [], []>} : vector<2x256xbf16>, vector<256x16xbf16>, vector<2x16xf32> -> vector<2x16xf32>
    %c0_9 = arith.constant 0 : index
    %c0_10 = arith.constant 0 : index
    %11 = vector.load %arg5[%c0_9, %c0_10] : memref<1x16xf32, #tpu.memory_space<vmem>>, vector<1x16xf32>
    %12 = vector.broadcast %11 : vector<1x16xf32> to vector<2x16xf32>
    %13 = arith.addf %10, %12 : vector<2x16xf32>
    %c0_11 = arith.constant 0 : index
    %c0_12 = arith.constant 0 : index
    %14 = vector.load %arg6[%c0_11, %c0_12] : memref<2x16xf32, #tpu.memory_space<vmem>>, vector<2x16xf32>
    tpu.vector_store %arg6[%c0_11, %c0_12], %13 {strides = array<i32>} : memref<2x16xf32, #tpu.memory_space<vmem>>, vector<2x16xf32>,
    return
  }
  func.func @transform_0(%arg0: i32) -> (i32, i32) {
    %c0_i32 = arith.constant 0 : i32
    %c0_i32_0 = arith.constant 0 : i32
    %c0_i32_1 = arith.constant 0 : i32
    return %c0_i32, %c0_i32_0 : i32, i32
  }
  func.func @transform_1(%arg0: i32) -> (i32, i32) {
    %c0_i32 = arith.constant 0 : i32
    %c0_i32_0 = arith.constant 0 : i32
    %c0_i32_1 = arith.constant 0 : i32
    return %c0_i32, %c0_i32_0 : i32, i32
  }
  func.func @transform_2(%arg0: i32) -> (i32, i32) {
    %c0_i32 = arith.constant 0 : i32
    %c0_i32_0 = arith.constant 0 : i32
    %c0_i32_1 = arith.constant 0 : i32
    return %c0_i32, %c0_i32_0 : i32, i32
  }
  func.func @transform_3(%arg0: i32) -> (i32, i32) {
    %c0_i32 = arith.constant 0 : i32
    %c0_i32_0 = arith.constant 0 : i32
    %c0_i32_1 = arith.constant 0 : i32
    return %c0_i32, %c0_i32_0 : i32, i32
  }
  func.func @transform_4(%arg0: i32) -> (i32, i32) {
    %c0_i32 = arith.constant 0 : i32
    %c0_i32_0 = arith.constant 0 : i32
    %c0_i32_1 = arith.constant 0 : i32
    return %c0_i32, %c0_i32_0 : i32, i32
  }
  func.func @transform_5(%arg0: i32) -> (i32, i32) {
    %c0_i32 = arith.constant 0 : i32
    %c0_i32_0 = arith.constant 0 : i32
    %c0_i32_1 = arith.constant 0 : i32
    return %c0_i32, %c0_i32_0 : i32, i32
  }
}

</mosaic_0001>

<bundles_post_ra>
// kernel: conv_encoder_forward.5
= control target key start
LH: loop header
LB: loop body
LE: loop exit
PB: predicated region body
PF: predicated region fallthrough
CT: control target
= control target key end

     0   :  { %s745_s12 = smov 0   ;;  %s747_s13 = smov 0   ;;  %s845_s0 = inlined_call_operand.vmem [shape: bf16[32,48], index: 0, kind: input, shape index: {}]   ;;  %s846_s1 = inlined_call_operand.vmem [shape: bf16[48,2048], index: 1, kind: input, shape index: {}]   ;;  %s847_s2 = inlined_call_operand.vmem [shape: f32[32,1], index: 2, kind: input, shape index: {}]   ;;  %s848_s3 = inlined_call_operand.vmem [shape: bf16[32,2048], index: 3, kind: output, shape index: {}]  }
   0x1   :  { %s749_s14 = smov 0  }
   0x2 LB: > { %s602_s15 = sadd.s32 4294967295, %s722_s14   ;;  %s762_s16 = sadd.s32 1, %s722_s14   ;;  %s722_s14 = sphi %s749_s14, %s852_s14   ;;  %s718_s13 = sphi %s747_s13, %s851_s13   ;;  %s714_s12 = sphi %s745_s12, %s850_s12  }
   0x3   : > { %s38_s17 = ssub.s32 %s722_s14, %s762_s16  ;;  %s41_s18 = sadd.s32 1, %s718_s13 }
   0x4   : > { %p39_p0 = scmp.eq.s32.totalorder %s38_s17, 0  ;;  %p48_p1 = scmp.ne.s32.totalorder %s718_s13, %s714_s12 }
   0x5   : > { %p49_p2 = scmp.eq.s32.totalorder %s722_s14, 0  ;;  %p99_p3 = scmp.eq.s32.totalorder %s602_s15, 3 }
   0x6   : > { %s773_s19 = scalar_select %p39_p0, %s718_s13, %s41_s18  }
   0x7   : > { %p50_p4 = por %p49_p2, %p48_p1  ;;  %p775_p5 = por %p99_p3, %p48_p1 }
   0x8   : > { %p605_p6 = scmp.ge.s32.totalorder %s722_s14, 4 }
   0xa   : > { %127 = sbr.rel (%p605_p6) target bundleno = 25 (0x19), region = 24 }
   0xf   : > { %130 = sbr.rel (!%p50_p4) target bundleno = 25 (0x19), region = 28  ;;  %s132_s21 = sand.u32 (%p50_p4), 1, %s718_s13  }
  0x10   : > { %s641_s22 = sshll.u32 (%p50_p4), %s722_s14, 4  ;;  %s651_s23 = smul.u32 (%p50_p4), 96, %s132_s21 }
  0x11   : > { %s137_s26 = scalar_lea.vmem (%p50_p4), %s846_s1, %s641_s22 }
  0x12   : > { %v150_v0 = vld [vmem:[%s137_s26] sm:$0xff] (%p50_p4)  ;;  %v152_v1 = vld [vmem:[%s137_s26 + $0x8] sm:$0xff] (%p50_p4)  ;;  %s134_s27 = scalar_lea.vmem (%p50_p4), [#allocation2], %s651_s23 }
  0x13   : > { %v154_v2 = vld [vmem:[%s137_s26 + $0x40] sm:$0xff] (%p50_p4)  ;;  %v156_v3 = vld [vmem:[%s137_s26 + $0x48] sm:$0xff] (%p50_p4)  ;;  %151 = vst [vmem:[%s134_s27] sm:$0xff] (%p50_p4), %v150_v0  ;;  %153 = vst [vmem:[%s134_s27 + $0x8] sm:$0xff] (%p50_p4), %v152_v1 }
  0x14   : > { %v158_v4 = vld [vmem:[%s137_s26 + $0x80] sm:$0xff]  ;;  %v160_v5 = vld [vmem:[%s137_s26 + $0x88] sm:$0xff]  ;;  %155 = vst [vmem:[%s134_s27 + $0x10] sm:$0xff] %v154_v2  ;;  %157 = vst [vmem:[%s134_s27 + $0x18] sm:$0xff] %v156_v3 }
  0x15   : > { %159 = vst [vmem:[%s134_s27 + $0x20] sm:$0xff] %v158_v4  ;;  %161 = vst [vmem:[%s134_s27 + $0x28] sm:$0xff] %v160_v5  ;;  %v162_v6 = vld [vmem:[%s137_s26 + $0xc0] sm:$0xff]  ;;  %v164_v7 = vld [vmem:[%s137_s26 + $0xc8] sm:$0xff] }
  0x16   : > { %v166_v8 = vld [vmem:[%s137_s26 + $0x100] sm:$0xff]  ;;  %163 = vst [vmem:[%s134_s27 + $0x30] sm:$0xff] %v162_v6  ;;  %165 = vst [vmem:[%s134_s27 + $0x38] sm:$0xff] %v164_v7  ;;  %v168_v9 = vld [vmem:[%s137_s26 + $0x108] sm:$0xff] }
  0x17   : > { %167 = vst [vmem:[%s134_s27 + $0x40] sm:$0xff] %v166_v8  ;;  %v170_v10 = vld [vmem:[%s137_s26 + $0x140] sm:$0xff]  ;;  %v172_v11 = vld [vmem:[%s137_s26 + $0x148] sm:$0xff]  ;;  %169 = vst [vmem:[%s134_s27 + $0x48] sm:$0xff] %v168_v9 }
  0x18   : > { %171 = vst [vmem:[%s134_s27 + $0x50] sm:$0xff] %v170_v10  ;;  %173 = vst [vmem:[%s134_s27 + $0x58] sm:$0xff] %v172_v11 }
  0x19 PF: > { %p608_p7 = scmp.ge.s32.totalorder %s722_s14, 1  ;;  %p178_p8 = scmp.lt.s32.totalorder %s722_s14, 5 }
  0x1b   : > { %p179_p9 = pnand %p608_p7, %p178_p8 }
  0x1c   : > { %s185_s28 = sand.u32 (!%p179_p9), 1, %s714_s12  }
  0x1d   : > { %182 = sbr.rel (%p179_p9) target bundleno = 272 (0x110), region = 51  ;;  %s609_s23 = sshll.u32 (!%p179_p9), %s185_s28, 6 }
  0x1e   : > { %s652_s29 = smul.u32 (!%p179_p9), 96, %s185_s28  ;;  %s810_s12 = scalar_lea.vmem (!%p179_p9), [#allocation3], %s609_s23 }
  0x20   : > { %s187_s9 = scalar_lea.vmem (!%p179_p9), [#allocation2], %s652_s29 }
  0x22   : > { %v724_v12 = vmov 0   ;;  %v226_v13 = vld [vmem:[%s847_s2] sm:$0xff]  ;;  %v227_v14 = vld [vmem:[%s847_s2 + $0x8] sm:$0xff]  ;;  %v228_v15 = vld [vmem:[%s847_s2 + $0x10] sm:$0xff]  ;;  %vm320_vm0 = vcmask 392192   ;;  %s650_s24 = sshll.u32 (%p775_p5), %s602_s15, 4 }
  0x23   : > { %359 = vmatprep.mubr.bf16.mxu0 %v724_v12  ;;  %412 = vmatprep.mubr.bf16.mxu1 %v724_v12  ;;  %v680_v16 = vld [vmem:[%s187_s9 + $0x44] ss:$16 sps:$4 sm:$0xff]   ;;  %v229_v17 = vld [vmem:[%s847_s2 + $0x18] sm:$0xff]  ;;  %v684_v19 = vld [vmem:[%s187_s9 + $0x40] ss:$16 sps:$4 sm:$0xff]   ;;  %s514_s27 = scalar_lea.vmem (%p775_p5), %s848_s3, %s650_s24 }
  0x24   : > { %678 = vset.pattern.permute.xlu0 %v724_v12  ;;  %679 = vset.pattern.permute.xlu1 %v724_v12  ;;  %v682_v18 = vld [vmem:[%s187_s9 + $0x4c] ss:$16 sps:$4 sm:$0xff]   ;;  %v685_v20 = vld [vmem:[%s187_s9 + $0x48] ss:$16 sps:$4 sm:$0xff]   ;;  %v686_v21 = vld [vmem:[%s187_s9 + $0x24] ss:$16 sps:$4 sm:$0xff]  }
  0x25   : > { %232 = vperm.xlu0 %678, %v226_v13   ;;  %242 = vperm.xlu1 %679, %v228_v15   ;;  %v688_v22 = vld [vmem:[%s187_s9 + $0x2c] ss:$16 sps:$4 sm:$0xff]   ;;  %v690_v23 = vld [vmem:[%s187_s9 + $0x20] ss:$16 sps:$4 sm:$0xff]   ;;  %v691_v24 = vld [vmem:[%s187_s9 + $0x28] ss:$16 sps:$4 sm:$0xff]  }
  0x26   : > { %337 = vmatprep.subr.bf16.mxu0 %v680_v16  ;;  %390 = vmatprep.subr.bf16.mxu1 %v682_v18  ;;  %v692_v25 = vld [vmem:[%s187_s9 + $0x4] ss:$16 sps:$4 sm:$0xff]   ;;  %v694_v26 = vld [vmem:[%s187_s9 + $0xc] ss:$16 sps:$4 sm:$0xff]   ;;  %v696_v27 = vld [vmem:[%s187_s9] ss:$16 sps:$4 sm:$0xff]  }
  0x27   : > { %338 = vmatpush1.bf16.msra.mxu0 %v684_v19  ;;  %391 = vmatpush1.bf16.msra.mxu1 %v685_v20  ;;  %v697_v28 = vld [vmem:[%s187_s9 + $0x8] ss:$16 sps:$4 sm:$0xff]   ;;  %v698_v29 = vld [vmem:[%s845_s0] sm:$0xff]  }
  0x28   : > { %339 = vmatprep.subr.bf16.mxu0 %v686_v21  ;;  %392 = vmatprep.subr.bf16.mxu1 %v688_v22  ;;  %v699_v30 = vld [vmem:[%s845_s0 + $0x8] sm:$0xff]  }
  0x29   : > { %237 = vperm.xlu0 %678, %v227_v14   ;;  %247 = vperm.xlu1 %679, %v229_v17  }
  0x2b   : > { %340 = vmatpush1.bf16.msra.mxu0 %v690_v23  ;;  %393 = vmatpush1.bf16.msra.mxu1 %v691_v24 }
  0x2c   : > { %341 = vmatprep.subr.bf16.mxu0 %v692_v25  ;;  %394 = vmatprep.subr.bf16.mxu1 %v694_v26 }
  0x2f   : > { %342 = vmatpush1.bf16.msra.mxu0 %v696_v27  ;;  %395 = vmatpush1.bf16.msra.mxu1 %v697_v28 }
  0x32   : > { %624 = vmatmul.mubr.msk.bf16.vlgmr.msra.gmra.mxu0 %vm320_vm0, %v698_v29  ;;  %626 = vmatmul.mubr.msk.bf16.vlgmr.msra.gmra.mxu1 %vm320_vm0, %v698_v29 }
  0x33   : > { %369 = vmatprep.mubr.bf16.mxu0 %v724_v12  ;;  %422 = vmatprep.mubr.bf16.mxu1 %v724_v12 }
  0x3a   : > { %625 = vmatmul.mubr.msk.bf16.gmra.mxu0 %vm320_vm0, %v699_v30  ;;  %627 = vmatmul.mubr.msk.bf16.gmra.mxu1 %vm320_vm0, %v699_v30 }
  0xa0   : > { %v233_v31 = vpop.permute.xlu0 %232  ;;  %v243_v53 = vpop.permute.xlu1 %242 }
  0xa4   : > { %v238_v40 = vpop.permute.xlu0 %237  ;;  %v248_v10 = vpop.permute.xlu1 %247 }
  0xf2   : > { %v361_v32 = vpop.f32.mrf.mxu0  ;;  %v414_v33 = vpop.f32.mrf.mxu1 }
  0xf3   : > { %v362_v34 = vadd.f32 %v361_v32, %v233_v31  ;;  %v415_v35 = vadd.f32 %v414_v33, %v233_v31 }
  0xf4   : > { %v363_v36 = vpop.f32.mrf.mxu0  ;;  %v416_v37 = vpop.f32.mrf.mxu1 }
  0xf5   : > { %v364_v38 = vadd.f32 %v363_v36, %v233_v31  ;;  %v417_v39 = vadd.f32 %v416_v37, %v233_v31  ;;  %v433_v43 = vmax.f32 %v362_v34, 0.0  ;;  %v435_v44 = vmax.f32 %v415_v35, 0.0 }
  0xf6   : > { %v365_v41 = vpop.f32.mrf.mxu0  ;;  %v418_v42 = vpop.f32.mrf.mxu1 }
  0xf7   : > { %v434_v45 = vmax.f32 %v364_v38, 0.0  ;;  %v436_v46 = vmax.f32 %v417_v39, 0.0  ;;  %v366_v47 = vadd.f32 %v365_v41, %v238_v40  ;;  %v419_v48 = vadd.f32 %v418_v42, %v238_v40 }
  0xf8   : > { %v367_v49 = vpop.f32.mrf.mxu0  ;;  %v420_v50 = vpop.f32.mrf.mxu1 }
  0xf9   : > { %v642_v51 = vpack.c.bf16 %v434_v45, %v433_v43  ;;  %v643_v52 = vpack.c.bf16 %v436_v46, %v435_v44  ;;  %v368_v54 = vadd.f32 %v367_v49, %v238_v40  ;;  %v421_v55 = vadd.f32 %v420_v50, %v238_v40 }
  0xfa   : > { %v371_v56 = vpop.f32.mrf.mxu0  ;;  %v424_v57 = vpop.f32.mrf.mxu1  ;;  %v437_v60 = vmax.f32 %v366_v47, 0.0  ;;  %v439_v61 = vmax.f32 %v419_v48, 0.0 }
  0xfb   : > { %497 = vst [vmem:[%s810_s12] sm:$0xff] %v642_v51  ;;  %498 = vst [vmem:[%s810_s12 + $0x8] sm:$0xff] %v643_v52  ;;  %v372_v58 = vadd.f32 %v371_v56, %v243_v53  ;;  %v425_v59 = vadd.f32 %v424_v57, %v243_v53  ;;  %v438_v62 = vmax.f32 %v368_v54, 0.0  ;;  %v440_v63 = vmax.f32 %v421_v55, 0.0 }
  0xfc   : > { %v373_v0 = vpop.f32.mrf.mxu0  ;;  %v426_v1 = vpop.f32.mrf.mxu1 }
  0xfd   : > { %v374_v2 = vadd.f32 %v373_v0, %v243_v53  ;;  %v427_v3 = vadd.f32 %v426_v1, %v243_v53  ;;  %v644_v4 = vpack.c.bf16 %v438_v62, %v437_v60  ;;  %v645_v5 = vpack.c.bf16 %v440_v63, %v439_v61 }
  0xfe   : > { %v375_v6 = vpop.f32.mrf.mxu0  ;;  %v428_v7 = vpop.f32.mrf.mxu1  ;;  %v441_v8 = vmax.f32 %v372_v58, 0.0  ;;  %v443_v9 = vmax.f32 %v425_v59, 0.0 }
  0xff   : > { %v442_v11 = vmax.f32 %v374_v2, 0.0  ;;  %v444_v12 = vmax.f32 %v427_v3, 0.0  ;;  %499 = vst [vmem:[%s810_s12 + $0x10] sm:$0xff] %v644_v4  ;;  %500 = vst [vmem:[%s810_s12 + $0x18] sm:$0xff] %v645_v5  ;;  %v376_v13 = vadd.f32 %v375_v6, %v248_v10  ;;  %v429_v14 = vadd.f32 %v428_v7, %v248_v10 }
 0x100   : > { %v377_v15 = vpop.f32.mrf.mxu0  ;;  %v430_v16 = vpop.f32.mrf.mxu1 }
 0x101   : > { %v646_v17 = vpack.c.bf16 %v442_v11, %v441_v8  ;;  %v647_v18 = vpack.c.bf16 %v444_v12, %v443_v9  ;;  %v378_v19 = vadd.f32 %v377_v15, %v248_v10  ;;  %v431_v20 = vadd.f32 %v430_v16, %v248_v10 }
 0x102   : > { %v445_v21 = vmax.f32 %v376_v13, 0.0  ;;  %v447_v22 = vmax.f32 %v429_v14, 0.0  ;;  %v527_v27 = vld [vmem:[%s810_s12] sm:$0xff] (%p775_p5)  ;;  %v529_v28 = vld [vmem:[%s810_s12 + $0x8] sm:$0xff] (%p775_p5) }
 0x103   : > { %501 = vst [vmem:[%s810_s12 + $0x20] sm:$0xff] %v646_v17  ;;  %502 = vst [vmem:[%s810_s12 + $0x28] sm:$0xff] %v647_v18  ;;  %v446_v23 = vmax.f32 %v378_v19, 0.0  ;;  %v448_v24 = vmax.f32 %v431_v20, 0.0  ;;  %511 = sbr.rel (!%p775_p5) target bundleno = 272 (0x110), region = 59 }
 0x104   : > { %528 = vst [vmem:[%s514_s27] sm:$0xff] (%p775_p5), %v527_v27  ;;  %530 = vst [vmem:[%s514_s27 + $0x8] sm:$0xff] (%p775_p5), %v529_v28 }
 0x105   : > { %v648_v25 = vpack.c.bf16 %v446_v23, %v445_v21  ;;  %v649_v26 = vpack.c.bf16 %v448_v24, %v447_v22 }
 0x106   : > { %v531_v29 = vld [vmem:[%s810_s12 + $0x10] sm:$0xff] (%p775_p5)  ;;  %v533_v30 = vld [vmem:[%s810_s12 + $0x18] sm:$0xff] (%p775_p5) }
 0x107   : > { %503 = vst [vmem:[%s810_s12 + $0x30] sm:$0xff] %v648_v25  ;;  %504 = vst [vmem:[%s810_s12 + $0x38] sm:$0xff] %v649_v26 }
 0x108   : > { %532 = vst [vmem:[%s514_s27 + $0x40] sm:$0xff] %v531_v29  ;;  %534 = vst [vmem:[%s514_s27 + $0x48] sm:$0xff] %v533_v30 }
 0x10a   : > { %v535_v31 = vld [vmem:[%s810_s12 + $0x20] sm:$0xff]  ;;  %v537_v32 = vld [vmem:[%s810_s12 + $0x28] sm:$0xff] }
 0x10b   : > { %536 = vst [vmem:[%s514_s27 + $0x80] sm:$0xff] %v535_v31  ;;  %538 = vst [vmem:[%s514_s27 + $0x88] sm:$0xff] %v537_v32 }
 0x10e   : > { %v539_v33 = vld [vmem:[%s810_s12 + $0x30] sm:$0xff]  ;;  %v541_v34 = vld [vmem:[%s810_s12 + $0x38] sm:$0xff] }
 0x10f   : > { %540 = vst [vmem:[%s514_s27 + $0xc0] sm:$0xff] %v539_v33  ;;  %542 = vst [vmem:[%s514_s27 + $0xc8] sm:$0xff] %v541_v34 }
 0x110 PF: > { %p10_p10 = scmp.ge.s32.totalorder %s762_s16, 6   ;;  %s850_s12 = smov %s718_s13 }
 0x111   : > { %s851_s13 = smov %s773_s19  ;;  %s852_s14 = smov %s762_s16 }
 0x112   :  { %12 = sbr.rel (!%p10_p10) target bundleno = 2 (0x2), region = 113 }

// kernel: conv_encoder_forward.6
= control target key start
LH: loop header
LB: loop body
LE: loop exit
PB: predicated region body
PF: predicated region fallthrough
CT: control target
= control target key end

     0   :  { %v1501_v8 = vmov 0   ;;  %s2004_s1 = inlined_call_operand.vmem [shape: bf16[512,512], index: 1, kind: input, shape index: {}]   ;;  %s2005_s0 = inlined_call_operand.vmem [shape: bf16[32,512], index: 0, kind: input, shape index: {}]   ;;  %s2006_s2 = inlined_call_operand.vmem [shape: f32[32,1], index: 2, kind: input, shape index: {}]   ;;  %s2007_s3 = inlined_call_operand.vmem [shape: bf16[32,512], index: 3, kind: output, shape index: {}]  }
   0x1   :  { %v1297_v0 = vld [vmem:[%s2004_s1 + $0xe4] ss:$16 sps:$4 sm:$0xff]   ;;  %v1301_v2 = vld [vmem:[%s2004_s1 + $0xe0] ss:$16 sps:$4 sm:$0xff]   ;;  %1295 = vset.pattern.permute.xlu0 %v1501_v8  ;;  %1296 = vset.pattern.permute.xlu1 %v1501_v8  ;;  %v1680_v52 = vld [vmem:[%s2005_s0 + $0xc] ss:$16 sps:$4 sm:$0xff]  }
   0x2   :  { %v1299_v1 = vld [vmem:[%s2004_s1 + $0x2e4] ss:$16 sps:$4 sm:$0xff]   ;;  %854 = vmatprep.subr.bf16.mxu0 %v1297_v0  ;;  %v1302_v3 = vld [vmem:[%s2004_s1 + $0x2e0] ss:$16 sps:$4 sm:$0xff]   ;;  %939 = vmatprep.mubr.bf16.mxu1 %v1680_v52  ;;  %v1402_v8 = vld [vmem:[%s2004_s1 + $0x2e8] ss:$16 sps:$4 sm:$0xff]  }
   0x3   :  { %907 = vmatprep.subr.bf16.mxu1 %v1299_v1  ;;  %v1303_v4 = vld [vmem:[%s2004_s1 + $0xc4] ss:$16 sps:$4 sm:$0xff]   ;;  %855 = vmatpush1.bf16.msra.mxu0 %v1301_v2  ;;  %v1307_v6 = vld [vmem:[%s2004_s1 + $0xc0] ss:$16 sps:$4 sm:$0xff]  }
   0x4   :  { %908 = vmatpush1.bf16.msra.mxu1 %v1302_v3  ;;  %v1305_v5 = vld [vmem:[%s2004_s1 + $0x2c4] ss:$16 sps:$4 sm:$0xff]   ;;  %856 = vmatprep.subr.bf16.mxu0 %v1303_v4  ;;  %v1308_v7 = vld [vmem:[%s2004_s1 + $0x2c0] ss:$16 sps:$4 sm:$0xff]   ;;  %v1401_v3 = vld [vmem:[%s2004_s1 + $0xec] ss:$16 sps:$4 sm:$0xff]  }
   0x5   :  { %909 = vmatprep.subr.bf16.mxu1 %v1305_v5  ;;  %v1309_v9 = vld [vmem:[%s2004_s1 + $0xa4] ss:$16 sps:$4 sm:$0xff]   ;;  %v1313_v11 = vld [vmem:[%s2004_s1 + $0xa0] ss:$16 sps:$4 sm:$0xff]   ;;  %v1404_v4 = vld [vmem:[%s2004_s1 + $0x2ec] ss:$16 sps:$4 sm:$0xff]  }
   0x6   :  { %v1311_v10 = vld [vmem:[%s2004_s1 + $0x2a4] ss:$16 sps:$4 sm:$0xff]   ;;  %v1314_v12 = vld [vmem:[%s2004_s1 + $0x2a0] ss:$16 sps:$4 sm:$0xff]  }
   0x7   :  { %857 = vmatpush1.bf16.msra.mxu0 %v1307_v6  ;;  %v1315_v13 = vld [vmem:[%s2004_s1 + $0x84] ss:$16 sps:$4 sm:$0xff]   ;;  %v1319_v15 = vld [vmem:[%s2004_s1 + $0x80] ss:$16 sps:$4 sm:$0xff]   ;;  %v1740_v6 = vld [vmem:[%s2005_s0 + $0x8] ss:$16 sps:$4 sm:$0xff]  }
   0x8   :  { %910 = vmatpush1.bf16.msra.mxu1 %v1308_v7  ;;  %858 = vmatprep.subr.bf16.mxu0 %v1309_v9  ;;  %v1317_v14 = vld [vmem:[%s2004_s1 + $0x284] ss:$16 sps:$4 sm:$0xff]   ;;  %v1320_v16 = vld [vmem:[%s2004_s1 + $0x280] ss:$16 sps:$4 sm:$0xff]   ;;  %v1399_v7 = vld [vmem:[%s2004_s1 + $0xe8] ss:$16 sps:$4 sm:$0xff]  }
   0x9   :  { %911 = vmatprep.subr.bf16.mxu1 %v1311_v10  ;;  %v1321_v17 = vld [vmem:[%s2004_s1 + $0x64] ss:$16 sps:$4 sm:$0xff]   ;;  %v1325_v19 = vld [vmem:[%s2004_s1 + $0x60] ss:$16 sps:$4 sm:$0xff]   ;;  %v1407_v9 = vld [vmem:[%s2004_s1 + $0xcc] ss:$16 sps:$4 sm:$0xff]  }
   0xa   :  { %v1323_v18 = vld [vmem:[%s2004_s1 + $0x264] ss:$16 sps:$4 sm:$0xff]   ;;  %v1326_v20 = vld [vmem:[%s2004_s1 + $0x260] ss:$16 sps:$4 sm:$0xff]   ;;  %v1410_v10 = vld [vmem:[%s2004_s1 + $0x2cc] ss:$16 sps:$4 sm:$0xff]  }
   0xb   :  { %859 = vmatpush1.bf16.msra.mxu0 %v1313_v11  ;;  %v1327_v21 = vld [vmem:[%s2004_s1 + $0x44] ss:$16 sps:$4 sm:$0xff]   ;;  %v1331_v23 = vld [vmem:[%s2004_s1 + $0x40] ss:$16 sps:$4 sm:$0xff]   ;;  %v1405_v11 = vld [vmem:[%s2004_s1 + $0xc8] ss:$16 sps:$4 sm:$0xff]  }
   0xc   :  { %912 = vmatpush1.bf16.msra.mxu1 %v1314_v12  ;;  %860 = vmatprep.subr.bf16.mxu0 %v1315_v13  ;;  %v1329_v22 = vld [vmem:[%s2004_s1 + $0x244] ss:$16 sps:$4 sm:$0xff]   ;;  %v1332_v24 = vld [vmem:[%s2004_s1 + $0x240] ss:$16 sps:$4 sm:$0xff]   ;;  %v1408_v12 = vld [vmem:[%s2004_s1 + $0x2c8] ss:$16 sps:$4 sm:$0xff]  }
   0xd   :  { %913 = vmatprep.subr.bf16.mxu1 %v1317_v14  ;;  %v1333_v25 = vld [vmem:[%s2004_s1 + $0x24] ss:$16 sps:$4 sm:$0xff]   ;;  %v1337_v27 = vld [vmem:[%s2004_s1 + $0x20] ss:$16 sps:$4 sm:$0xff]   ;;  %v1413_v13 = vld [vmem:[%s2004_s1 + $0xac] ss:$16 sps:$4 sm:$0xff]  }
   0xe   :  { %v1335_v26 = vld [vmem:[%s2004_s1 + $0x224] ss:$16 sps:$4 sm:$0xff]   ;;  %v1338_v28 = vld [vmem:[%s2004_s1 + $0x220] ss:$16 sps:$4 sm:$0xff]   ;;  %v1416_v14 = vld [vmem:[%s2004_s1 + $0x2ac] ss:$16 sps:$4 sm:$0xff]  }
   0xf   :  { %861 = vmatpush1.bf16.msra.mxu0 %v1319_v15  ;;  %v1339_v29 = vld [vmem:[%s2004_s1 + $0x4] ss:$16 sps:$4 sm:$0xff]   ;;  %v1343_v31 = vld [vmem:[%s2004_s1] ss:$16 sps:$4 sm:$0xff]   ;;  %v1411_v15 = vld [vmem:[%s2004_s1 + $0xa8] ss:$16 sps:$4 sm:$0xff]  }
  0x10   :  { %914 = vmatpush1.bf16.msra.mxu1 %v1320_v16  ;;  %862 = vmatprep.subr.bf16.mxu0 %v1321_v17  ;;  %v1341_v30 = vld [vmem:[%s2004_s1 + $0x204] ss:$16 sps:$4 sm:$0xff]   ;;  %v1344_v32 = vld [vmem:[%s2004_s1 + $0x200] ss:$16 sps:$4 sm:$0xff]   ;;  %v1414_v16 = vld [vmem:[%s2004_s1 + $0x2a8] ss:$16 sps:$4 sm:$0xff]  }
  0x11   :  { %915 = vmatprep.subr.bf16.mxu1 %v1323_v18  ;;  %v1345_v33 = vld [vmem:[%s2004_s1 + $0x1e4] ss:$16 sps:$4 sm:$0xff]   ;;  %v1349_v35 = vld [vmem:[%s2004_s1 + $0x1e0] ss:$16 sps:$4 sm:$0xff]   ;;  %v1419_v17 = vld [vmem:[%s2004_s1 + $0x8c] ss:$16 sps:$4 sm:$0xff]  }
  0x12   :  { %v1347_v34 = vld [vmem:[%s2004_s1 + $0x3e4] ss:$16 sps:$4 sm:$0xff]   ;;  %v1350_v36 = vld [vmem:[%s2004_s1 + $0x3e0] ss:$16 sps:$4 sm:$0xff]   ;;  %v1422_v18 = vld [vmem:[%s2004_s1 + $0x28c] ss:$16 sps:$4 sm:$0xff]  }
  0x13   :  { %863 = vmatpush1.bf16.msra.mxu0 %v1325_v19  ;;  %v1351_v37 = vld [vmem:[%s2004_s1 + $0x1c4] ss:$16 sps:$4 sm:$0xff]   ;;  %v1355_v39 = vld [vmem:[%s2004_s1 + $0x1c0] ss:$16 sps:$4 sm:$0xff]   ;;  %v1417_v19 = vld [vmem:[%s2004_s1 + $0x88] ss:$16 sps:$4 sm:$0xff]  }
  0x14   :  { %916 = vmatpush1.bf16.msra.mxu1 %v1326_v20  ;;  %864 = vmatprep.subr.bf16.mxu0 %v1327_v21  ;;  %v1353_v38 = vld [vmem:[%s2004_s1 + $0x3c4] ss:$16 sps:$4 sm:$0xff]   ;;  %v1356_v40 = vld [vmem:[%s2004_s1 + $0x3c0] ss:$16 sps:$4 sm:$0xff]   ;;  %v1420_v20 = vld [vmem:[%s2004_s1 + $0x288] ss:$16 sps:$4 sm:$0xff]  }
  0x15   :  { %917 = vmatprep.subr.bf16.mxu1 %v1329_v22  ;;  %v1357_v41 = vld [vmem:[%s2004_s1 + $0x1a4] ss:$16 sps:$4 sm:$0xff]   ;;  %v1361_v43 = vld [vmem:[%s2004_s1 + $0x1a0] ss:$16 sps:$4 sm:$0xff]   ;;  %v1425_v21 = vld [vmem:[%s2004_s1 + $0x6c] ss:$16 sps:$4 sm:$0xff]  }
  0x16   :  { %v1359_v42 = vld [vmem:[%s2004_s1 + $0x3a4] ss:$16 sps:$4 sm:$0xff]   ;;  %v1362_v44 = vld [vmem:[%s2004_s1 + $0x3a0] ss:$16 sps:$4 sm:$0xff]   ;;  %v1428_v22 = vld [vmem:[%s2004_s1 + $0x26c] ss:$16 sps:$4 sm:$0xff]  }
  0x17   :  { %865 = vmatpush1.bf16.msra.mxu0 %v1331_v23  ;;  %v1363_v45 = vld [vmem:[%s2004_s1 + $0x184] ss:$16 sps:$4 sm:$0xff]   ;;  %v1367_v47 = vld [vmem:[%s2004_s1 + $0x180] ss:$16 sps:$4 sm:$0xff]   ;;  %v1423_v23 = vld [vmem:[%s2004_s1 + $0x68] ss:$16 sps:$4 sm:$0xff]  }
  0x18   :  { %918 = vmatpush1.bf16.msra.mxu1 %v1332_v24  ;;  %866 = vmatprep.subr.bf16.mxu0 %v1333_v25  ;;  %v1365_v46 = vld [vmem:[%s2004_s1 + $0x384] ss:$16 sps:$4 sm:$0xff]   ;;  %v1368_v48 = vld [vmem:[%s2004_s1 + $0x380] ss:$16 sps:$4 sm:$0xff]   ;;  %v1426_v24 = vld [vmem:[%s2004_s1 + $0x268] ss:$16 sps:$4 sm:$0xff]  }
  0x19   :  { %919 = vmatprep.subr.bf16.mxu1 %v1335_v26  ;;  %v1369_v49 = vld [vmem:[%s2004_s1 + $0x164] ss:$16 sps:$4 sm:$0xff]   ;;  %v1373_v53 = vld [vmem:[%s2004_s1 + $0x160] ss:$16 sps:$4 sm:$0xff]   ;;  %v1431_v25 = vld [vmem:[%s2004_s1 + $0x4c] ss:$16 sps:$4 sm:$0xff]  }
  0x1a   :  { %v1672_v50 = vld [vmem:[%s2005_s0 + $0x4] ss:$16 sps:$4 sm:$0xff]   ;;  %v1374_v54 = vld [vmem:[%s2004_s1 + $0x360] ss:$16 sps:$4 sm:$0xff]   ;;  %v1434_v26 = vld [vmem:[%s2004_s1 + $0x24c] ss:$16 sps:$4 sm:$0xff]  }
  0x1b   :  { %867 = vmatpush1.bf16.msra.mxu0 %v1337_v27  ;;  %v1371_v51 = vld [vmem:[%s2004_s1 + $0x364] ss:$16 sps:$4 sm:$0xff]   ;;  %886 = vmatprep.mubr.bf16.mxu0 %v1672_v50  ;;  %v1379_v57 = vld [vmem:[%s2004_s1 + $0x140] ss:$16 sps:$4 sm:$0xff]  }
  0x1c   :  { %920 = vmatpush1.bf16.msra.mxu1 %v1338_v28  ;;  %868 = vmatprep.subr.bf16.mxu0 %v1339_v29  ;;  %v1375_v55 = vld [vmem:[%s2004_s1 + $0x144] ss:$16 sps:$4 sm:$0xff]   ;;  %v1380_v58 = vld [vmem:[%s2004_s1 + $0x340] ss:$16 sps:$4 sm:$0xff]   ;;  %v1429_v29 = vld [vmem:[%s2004_s1 + $0x48] ss:$16 sps:$4 sm:$0xff]  }
  0x1d   :  { %921 = vmatprep.subr.bf16.mxu1 %v1341_v30  ;;  %v1377_v56 = vld [vmem:[%s2004_s1 + $0x344] ss:$16 sps:$4 sm:$0xff]   ;;  %v1385_v61 = vld [vmem:[%s2004_s1 + $0x120] ss:$16 sps:$4 sm:$0xff]   ;;  %v1821_v30 = vld [vmem:[%s2005_s0 + $0x2c] ss:$16 sps:$4 sm:$0xff]  }
  0x1e   :  { %v1381_v59 = vld [vmem:[%s2004_s1 + $0x124] ss:$16 sps:$4 sm:$0xff]   ;;  %v1386_v62 = vld [vmem:[%s2004_s1 + $0x320] ss:$16 sps:$4 sm:$0xff]  }
  0x1f   :  { %869 = vmatpush1.bf16.msra.mxu0 %v1343_v31  ;;  %v1383_v60 = vld [vmem:[%s2004_s1 + $0x324] ss:$16 sps:$4 sm:$0xff]   ;;  %v1391_v1 = vld [vmem:[%s2004_s1 + $0x100] ss:$16 sps:$4 sm:$0xff]   ;;  %v1432_v31 = vld [vmem:[%s2004_s1 + $0x248] ss:$16 sps:$4 sm:$0xff]  }
  0x20   :  { %922 = vmatpush1.bf16.msra.mxu1 %v1344_v32  ;;  %870 = vmatprep.subr.bf16.mxu0 %v1345_v33  ;;  %v1387_v63 = vld [vmem:[%s2004_s1 + $0x104] ss:$16 sps:$4 sm:$0xff]   ;;  %v1392_v2 = vld [vmem:[%s2004_s1 + $0x300] ss:$16 sps:$4 sm:$0xff]   ;;  %v1830_v32 = vld [vmem:[%s2005_s0 + $0x28] ss:$16 sps:$4 sm:$0xff]  }
  0x21   :  { %923 = vmatprep.subr.bf16.mxu1 %v1347_v34  ;;  %v1389_v0 = vld [vmem:[%s2004_s1 + $0x304] ss:$16 sps:$4 sm:$0xff]   ;;  %v1735_v5 = vld [vmem:[%s2005_s0] ss:$16 sps:$4 sm:$0xff]   ;;  %v1437_v33 = vld [vmem:[%s2004_s1 + $0x2c] ss:$16 sps:$4 sm:$0xff]  }
  0x22   :  { %v1807_v27 = vld [vmem:[%s2005_s0 + $0x24] ss:$16 sps:$4 sm:$0xff]   ;;  %v1812_v28 = vld [vmem:[%s2005_s0 + $0x20] ss:$16 sps:$4 sm:$0xff]   ;;  %v1440_v34 = vld [vmem:[%s2004_s1 + $0x22c] ss:$16 sps:$4 sm:$0xff]  }
  0x23   :  { %871 = vmatpush2.bf16.msra.mxu0 %v1349_v35  ;;  %v1435_v35 = vld [vmem:[%s2004_s1 + $0x28] ss:$16 sps:$4 sm:$0xff]  }
  0x24   :  { %924 = vmatpush2.bf16.msra.mxu1 %v1350_v36  ;;  %872 = vmatprep.subr.bf16.mxu0 %v1351_v37  ;;  %v1438_v36 = vld [vmem:[%s2004_s1 + $0x228] ss:$16 sps:$4 sm:$0xff]   ;;  %v1443_v37 = vld [vmem:[%s2004_s1 + $0xc] ss:$16 sps:$4 sm:$0xff]  }
  0x25   :  { %925 = vmatprep.subr.bf16.mxu1 %v1353_v38  ;;  %v1446_v38 = vld [vmem:[%s2004_s1 + $0x20c] ss:$16 sps:$4 sm:$0xff]  }
  0x27   :  { %873 = vmatpush2.bf16.msra.mxu0 %v1355_v39  ;;  %v150_v39 = vld [vmem:[%s2006_s2] sm:$0xff] }
  0x28   :  { %926 = vmatpush2.bf16.msra.mxu1 %v1356_v40  ;;  %874 = vmatprep.subr.bf16.mxu0 %v1357_v41  ;;  %v152_v40 = vld [vmem:[%s2006_s2 + $0x10] sm:$0xff]  ;;  %v1441_v41 = vld [vmem:[%s2004_s1 + $0x8] ss:$16 sps:$4 sm:$0xff]  }
  0x29   :  { %927 = vmatprep.subr.bf16.mxu1 %v1359_v42  ;;  %156 = vperm.xlu0 %1295, %v150_v39   ;;  %v1444_v42 = vld [vmem:[%s2004_s1 + $0x208] ss:$16 sps:$4 sm:$0xff]  }
  0x2a   :  { %166 = vperm.xlu1 %1296, %v152_v40  }
  0x2b   :  { %875 = vmatpush2.bf16.msra.mxu0 %v1361_v43  ;;  %v151_v43 = vld [vmem:[%s2006_s2 + $0x8] sm:$0xff] }
  0x2c   :  { %928 = vmatpush2.bf16.msra.mxu1 %v1362_v44  ;;  %876 = vmatprep.subr.bf16.mxu0 %v1363_v45  ;;  %v1449_v44 = vld [vmem:[%s2004_s1 + $0x1ec] ss:$16 sps:$4 sm:$0xff]  }
  0x2d   :  { %929 = vmatprep.subr.bf16.mxu1 %v1365_v46  ;;  %v1452_v45 = vld [vmem:[%s2004_s1 + $0x3ec] ss:$16 sps:$4 sm:$0xff]   ;;  %161 = vperm.xlu0 %1295, %v151_v43  }
  0x2e   :  { %v153_v46 = vld [vmem:[%s2006_s2 + $0x18] sm:$0xff] }
  0x2f   :  { %877 = vmatpush2.bf16.msra.mxu0 %v1367_v47  ;;  %v1447_v47 = vld [vmem:[%s2004_s1 + $0x1e8] ss:$16 sps:$4 sm:$0xff]   ;;  %171 = vperm.xlu1 %1296, %v153_v46  }
  0x30   :  { %930 = vmatpush2.bf16.msra.mxu1 %v1368_v48  ;;  %878 = vmatprep.subr.bf16.mxu0 %v1369_v49  ;;  %v1450_v48 = vld [vmem:[%s2004_s1 + $0x3e8] ss:$16 sps:$4 sm:$0xff]   ;;  %v1455_v49 = vld [vmem:[%s2004_s1 + $0x1cc] ss:$16 sps:$4 sm:$0xff]  }
  0x31   :  { %931 = vmatprep.subr.bf16.mxu1 %v1371_v51  ;;  %v1453_v51 = vld [vmem:[%s2004_s1 + $0x1c8] ss:$16 sps:$4 sm:$0xff]  }
  0x33   :  { %879 = vmatpush2.bf16.msra.mxu0 %v1373_v53  ;;  %v1461_v53 = vld [vmem:[%s2004_s1 + $0x1ac] ss:$16 sps:$4 sm:$0xff]  }
  0x34   :  { %932 = vmatpush2.bf16.msra.mxu1 %v1374_v54  ;;  %880 = vmatprep.subr.bf16.mxu0 %v1375_v55  ;;  %v1464_v54 = vld [vmem:[%s2004_s1 + $0x3ac] ss:$16 sps:$4 sm:$0xff]   ;;  %v1459_v55 = vld [vmem:[%s2004_s1 + $0x1a8] ss:$16 sps:$4 sm:$0xff]  }
  0x35   :  { %933 = vmatprep.subr.bf16.mxu1 %v1377_v56  ;;  %v1462_v56 = vld [vmem:[%s2004_s1 + $0x3a8] ss:$16 sps:$4 sm:$0xff]  }
  0x37   :  { %881 = vmatpush2.bf16.msra.mxu0 %v1379_v57  ;;  %v1467_v57 = vld [vmem:[%s2004_s1 + $0x18c] ss:$16 sps:$4 sm:$0xff]  }
  0x38   :  { %934 = vmatpush2.bf16.msra.mxu1 %v1380_v58  ;;  %882 = vmatprep.subr.bf16.mxu0 %v1381_v59  ;;  %v1470_v58 = vld [vmem:[%s2004_s1 + $0x38c] ss:$16 sps:$4 sm:$0xff]   ;;  %v1465_v59 = vld [vmem:[%s2004_s1 + $0x188] ss:$16 sps:$4 sm:$0xff]  }
  0x39   :  { %935 = vmatprep.subr.bf16.mxu1 %v1383_v60  ;;  %v1468_v60 = vld [vmem:[%s2004_s1 + $0x388] ss:$16 sps:$4 sm:$0xff]  }
  0x3b   :  { %883 = vmatpush2.bf16.msra.mxu0 %v1385_v61  ;;  %v1473_v61 = vld [vmem:[%s2004_s1 + $0x16c] ss:$16 sps:$4 sm:$0xff]  }
  0x3c   :  { %936 = vmatpush2.bf16.msra.mxu1 %v1386_v62  ;;  %884 = vmatprep.subr.bf16.mxu0 %v1387_v63  ;;  %v1476_v62 = vld [vmem:[%s2004_s1 + $0x36c] ss:$16 sps:$4 sm:$0xff]   ;;  %v1471_v63 = vld [vmem:[%s2004_s1 + $0x168] ss:$16 sps:$4 sm:$0xff]  }
  0x3d   :  { %937 = vmatprep.subr.bf16.mxu1 %v1389_v0  ;;  %v1474_v0 = vld [vmem:[%s2004_s1 + $0x368] ss:$16 sps:$4 sm:$0xff]  }
  0x3f   :  { %885 = vmatpush2.bf16.msra.mxu0 %v1391_v1  ;;  %v1485_v1 = vld [vmem:[%s2004_s1 + $0x14c] ss:$16 sps:$4 sm:$0xff]  }
  0x40   :  { %938 = vmatpush2.bf16.msra.mxu1 %v1392_v2  ;;  %960 = vmatprep.subr.bf16.mxu0 %v1401_v3  ;;  %v1488_v2 = vld [vmem:[%s2004_s1 + $0x34c] ss:$16 sps:$4 sm:$0xff]   ;;  %v1483_v3 = vld [vmem:[%s2004_s1 + $0x148] ss:$16 sps:$4 sm:$0xff]  }
  0x41   :  { %1013 = vmatprep.subr.bf16.mxu1 %v1404_v4  ;;  %v1486_v4 = vld [vmem:[%s2004_s1 + $0x348] ss:$16 sps:$4 sm:$0xff]  }
  0x42   :  { %887 = vmatmul.mubr.bf16.vlgmr.msra.gmra.mxu0 %v1735_v5 }
  0x43   :  { %940 = vmatmul.mubr.bf16.vlgmr.msra.gmra.mxu1 %v1740_v6  ;;  %961 = vmatpush1.bf16.msra.mxu0 %v1399_v7  ;;  %v1491_v7 = vld [vmem:[%s2004_s1 + $0x12c] ss:$16 sps:$4 sm:$0xff]  }
  0x44   :  { %1014 = vmatpush1.bf16.msra.mxu1 %v1402_v8  ;;  %962 = vmatprep.subr.bf16.mxu0 %v1407_v9  ;;  %v1494_v8 = vld [vmem:[%s2004_s1 + $0x32c] ss:$16 sps:$4 sm:$0xff]   ;;  %v1489_v9 = vld [vmem:[%s2004_s1 + $0x128] ss:$16 sps:$4 sm:$0xff]  }
  0x45   :  { %1015 = vmatprep.subr.bf16.mxu1 %v1410_v10  ;;  %896 = vmatprep.mubr.bf16.mxu0 %v1807_v27  ;;  %v1492_v10 = vld [vmem:[%s2004_s1 + $0x328] ss:$16 sps:$4 sm:$0xff]  }
  0x46   :  { %949 = vmatprep.mubr.bf16.mxu1 %v1821_v30 }
  0x47   :  { %963 = vmatpush1.bf16.msra.mxu0 %v1405_v11  ;;  %v1497_v11 = vld [vmem:[%s2004_s1 + $0x10c] ss:$16 sps:$4 sm:$0xff]  }
  0x48   :  { %1016 = vmatpush1.bf16.msra.mxu1 %v1408_v12  ;;  %964 = vmatprep.subr.bf16.mxu0 %v1413_v13  ;;  %v1500_v12 = vld [vmem:[%s2004_s1 + $0x30c] ss:$16 sps:$4 sm:$0xff]   ;;  %v1495_v13 = vld [vmem:[%s2004_s1 + $0x108] ss:$16 sps:$4 sm:$0xff]  }
  0x49   :  { %1017 = vmatprep.subr.bf16.mxu1 %v1416_v14  ;;  %v1498_v14 = vld [vmem:[%s2004_s1 + $0x308] ss:$16 sps:$4 sm:$0xff]  }
  0x4a   :  { %897 = vmatmul.mubr.bf16.gmra.mxu0 %v1812_v28 }
  0x4b   :  { %965 = vmatpush1.bf16.msra.mxu0 %v1411_v15  ;;  %992 = vmatprep.mubr.bf16.mxu0 %v1672_v50  ;;  %v1458_v50 = vld [vmem:[%s2004_s1 + $0x3cc] ss:$16 sps:$4 sm:$0xff]  }
  0x4c   :  { %1018 = vmatpush1.bf16.msra.mxu1 %v1414_v16  ;;  %966 = vmatprep.subr.bf16.mxu0 %v1419_v17 }
  0x4d   :  { %1019 = vmatprep.subr.bf16.mxu1 %v1422_v18  ;;  %950 = vmatmul.mubr.bf16.gmra.mxu1 %v1830_v32 }
  0x4e   :  { %1045 = vmatprep.mubr.bf16.mxu1 %v1680_v52  ;;  %v1456_v52 = vld [vmem:[%s2004_s1 + $0x3c8] ss:$16 sps:$4 sm:$0xff]  }
  0x4f   :  { %967 = vmatpush1.bf16.msra.mxu0 %v1417_v19 }
  0x50   :  { %1020 = vmatpush1.bf16.msra.mxu1 %v1420_v20  ;;  %968 = vmatprep.subr.bf16.mxu0 %v1425_v21 }
  0x51   :  { %1021 = vmatprep.subr.bf16.mxu1 %v1428_v22 }
  0x53   :  { %969 = vmatpush1.bf16.msra.mxu0 %v1423_v23 }
  0x54   :  { %1022 = vmatpush1.bf16.msra.mxu1 %v1426_v24  ;;  %970 = vmatprep.subr.bf16.mxu0 %v1431_v25 }
  0x55   :  { %1023 = vmatprep.subr.bf16.mxu1 %v1434_v26 }
  0x57   :  { %971 = vmatpush1.bf16.msra.mxu0 %v1429_v29 }
  0x58   :  { %1024 = vmatpush1.bf16.msra.mxu1 %v1432_v31  ;;  %972 = vmatprep.subr.bf16.mxu0 %v1437_v33 }
  0x59   :  { %1025 = vmatprep.subr.bf16.mxu1 %v1440_v34 }
  0x5b   :  { %973 = vmatpush1.bf16.msra.mxu0 %v1435_v35 }
  0x5c   :  { %1026 = vmatpush1.bf16.msra.mxu1 %v1438_v36  ;;  %974 = vmatprep.subr.bf16.mxu0 %v1443_v37 }
  0x5d   :  { %1027 = vmatprep.subr.bf16.mxu1 %v1446_v38 }
  0x5f   :  { %975 = vmatpush1.bf16.msra.mxu0 %v1441_v41 }
  0x60   :  { %1028 = vmatpush1.bf16.msra.mxu1 %v1444_v42  ;;  %976 = vmatprep.subr.bf16.mxu0 %v1449_v44 }
  0x61   :  { %1029 = vmatprep.subr.bf16.mxu1 %v1452_v45 }
  0x63   :  { %977 = vmatpush2.bf16.msra.mxu0 %v1447_v47 }
  0x64   :  { %1030 = vmatpush2.bf16.msra.mxu1 %v1450_v48  ;;  %978 = vmatprep.subr.bf16.mxu0 %v1455_v49 }
  0x65   :  { %1031 = vmatprep.subr.bf16.mxu1 %v1458_v50 }
  0x67   :  { %979 = vmatpush2.bf16.msra.mxu0 %v1453_v51 }
  0x68   :  { %1032 = vmatpush2.bf16.msra.mxu1 %v1456_v52  ;;  %980 = vmatprep.subr.bf16.mxu0 %v1461_v53 }
  0x69   :  { %1033 = vmatprep.subr.bf16.mxu1 %v1464_v54 }
  0x6b   :  { %981 = vmatpush2.bf16.msra.mxu0 %v1459_v55 }
  0x6c   :  { %1034 = vmatpush2.bf16.msra.mxu1 %v1462_v56  ;;  %982 = vmatprep.subr.bf16.mxu0 %v1467_v57 }
  0x6d   :  { %1035 = vmatprep.subr.bf16.mxu1 %v1470_v58 }
  0x6f   :  { %983 = vmatpush2.bf16.msra.mxu0 %v1465_v59 }
  0x70   :  { %1036 = vmatpush2.bf16.msra.mxu1 %v1468_v60  ;;  %984 = vmatprep.subr.bf16.mxu0 %v1473_v61 }
  0x71   :  { %1037 = vmatprep.subr.bf16.mxu1 %v1476_v62 }
  0x73   :  { %985 = vmatpush2.bf16.msra.mxu0 %v1471_v63 }
  0x74   :  { %1038 = vmatpush2.bf16.msra.mxu1 %v1474_v0  ;;  %986 = vmatprep.subr.bf16.mxu0 %v1485_v1 }
  0x75   :  { %1039 = vmatprep.subr.bf16.mxu1 %v1488_v2 }
  0x77   :  { %987 = vmatpush2.bf16.msra.mxu0 %v1483_v3 }
  0x78   :  { %1040 = vmatpush2.bf16.msra.mxu1 %v1486_v4  ;;  %988 = vmatprep.subr.bf16.mxu0 %v1491_v7 }
  0x79   :  { %1041 = vmatprep.subr.bf16.mxu1 %v1494_v8 }
  0x7b   :  { %989 = vmatpush2.bf16.msra.mxu0 %v1489_v9 }
  0x7c   :  { %1042 = vmatpush2.bf16.msra.mxu1 %v1492_v10  ;;  %990 = vmatprep.subr.bf16.mxu0 %v1497_v11 }
  0x7d   :  { %1043 = vmatprep.subr.bf16.mxu1 %v1500_v12 }
  0x7f   :  { %991 = vmatpush2.bf16.msra.mxu0 %v1495_v13 }
  0x80   :  { %1044 = vmatpush2.bf16.msra.mxu1 %v1498_v14 }
  0x82   :  { %993 = vmatmul.mubr.bf16.vlgmr.msra.gmra.mxu0 %v1735_v5 }
  0x83   :  { %1046 = vmatmul.mubr.bf16.vlgmr.msra.gmra.mxu1 %v1740_v6  ;;  %1002 = vmatprep.mubr.bf16.mxu0 %v1807_v27 }
  0x84   :  { %1055 = vmatprep.mubr.bf16.mxu1 %v1821_v30 }
  0x8a   :  { %1003 = vmatmul.mubr.bf16.gmra.mxu0 %v1812_v28 }
  0x8b   :  { %1056 = vmatmul.mubr.bf16.gmra.mxu1 %v1830_v32 }
  0xa4   :  { %v157_v15 = vpop.permute.xlu0 %156 }
  0xa5   :  { %v167_v36 = vpop.permute.xlu1 %166 }
  0xa8   :  { %v1974_v19 = vpop.permute.xlu0 %161 }
  0xaa   :  { %v172_v41 = vpop.permute.xlu1 %171 }
 0x102   :  { %v888_v16 = vpop.f32.mrf.mxu0 }
 0x103   :  { %v941_v17 = vpop.f32.mrf.mxu1  ;;  %v889_v18 = vadd.f32 %v888_v16, %v157_v15 }
 0x104   :  { %v890_v20 = vpop.f32.mrf.mxu0 }
 0x105   :  { %v943_v21 = vpop.f32.mrf.mxu1  ;;  %v942_v22 = vadd.f32 %v941_v17, %v889_v18  ;;  %v891_v5 = vadd.f32 %v890_v20, %v157_v15 }
 0x106   :  { %v892_v23 = vpop.f32.mrf.mxu0 }
 0x107   :  { %v945_v6 = vpop.f32.mrf.mxu1  ;;  %v1066_v24 = vmax.f32 %v942_v22, 0.0  ;;  %v944_v25 = vadd.f32 %v943_v21, %v891_v5  ;;  %v893_v26 = vadd.f32 %v892_v23, %v1974_v19 }
 0x108   :  { %v894_v27 = vpop.f32.mrf.mxu0 }
 0x109   :  { %v1067_v28 = vmax.f32 %v944_v25, 0.0  ;;  %v946_v29 = vadd.f32 %v945_v6, %v893_v26  ;;  %v895_v30 = vadd.f32 %v894_v27, %v1974_v19  ;;  %v947_v31 = vpop.f32.mrf.mxu1 }
 0x10a   :  { %v898_v38 = vpop.f32.mrf.mxu0 }
 0x10b   :  { %v1286_v32 = vpack.c.bf16 %v1067_v28, %v1066_v24  ;;  %v948_v33 = vadd.f32 %v947_v31, %v895_v30  ;;  %v1070_v34 = vmax.f32 %v946_v29, 0.0  ;;  %v899_v39 = vadd.f32 %v898_v38, %v167_v36 }
 0x10c   :  { %v900_v40 = vpop.f32.mrf.mxu0 }
 0x10d   :  { %1130 = vst [vmem:[%s2007_s3] sm:$0xff] %v1286_v32  ;;  %v1071_v35 = vmax.f32 %v948_v33, 0.0  ;;  %v901_v42 = vadd.f32 %v900_v40, %v167_v36  ;;  %v951_v43 = vpop.f32.mrf.mxu1 }
 0x10e   :  { %v902_v44 = vpop.f32.mrf.mxu0  ;;  %v952_v45 = vadd.f32 %v951_v43, %v899_v39 }
 0x10f   :  { %v1288_v37 = vpack.c.bf16 %v1071_v35, %v1070_v34  ;;  %v903_v46 = vadd.f32 %v902_v44, %v172_v41  ;;  %v953_v47 = vpop.f32.mrf.mxu1 }
 0x110   :  { %v904_v48 = vpop.f32.mrf.mxu0  ;;  %v1074_v49 = vmax.f32 %v952_v45, 0.0  ;;  %v954_v50 = vadd.f32 %v953_v47, %v901_v42 }
 0x111   :  { %1132 = vst [vmem:[%s2007_s3 + $0x10] sm:$0xff] %v1288_v37  ;;  %v905_v51 = vadd.f32 %v904_v48, %v172_v41  ;;  %v955_v52 = vpop.f32.mrf.mxu1 }
 0x112   :  { %v1075_v53 = vmax.f32 %v954_v50, 0.0  ;;  %v956_v54 = vadd.f32 %v955_v52, %v903_v46 }
 0x113   :  { %v957_v55 = vpop.f32.mrf.mxu1 }
 0x114   :  { %v1290_v56 = vpack.c.bf16 %v1075_v53, %v1074_v49  ;;  %v1078_v57 = vmax.f32 %v956_v54, 0.0  ;;  %v958_v58 = vadd.f32 %v957_v55, %v905_v51 }
 0x116   :  { %1134 = vst [vmem:[%s2007_s3 + $0x20] sm:$0xff] %v1290_v56  ;;  %v1079_v59 = vmax.f32 %v958_v58, 0.0 }
 0x118   :  { %v1292_v60 = vpack.c.bf16 %v1079_v59, %v1078_v57 }
 0x11a   :  { %1136 = vst [vmem:[%s2007_s3 + $0x30] sm:$0xff] %v1292_v60 }
 0x142   :  { %v994_v61 = vpop.f32.mrf.mxu0 }
 0x143   :  { %v1047_v62 = vpop.f32.mrf.mxu1  ;;  %v995_v63 = vadd.f32 %v994_v61, %v157_v15 }
 0x144   :  { %v996_v0 = vpop.f32.mrf.mxu0 }
 0x145   :  { %v1049_v1 = vpop.f32.mrf.mxu1  ;;  %v1048_v2 = vadd.f32 %v1047_v62, %v995_v63  ;;  %v997_v3 = vadd.f32 %v996_v0, %v157_v15 }
 0x146   :  { %v998_v4 = vpop.f32.mrf.mxu0 }
 0x147   :  { %v1051_v7 = vpop.f32.mrf.mxu1  ;;  %v1050_v8 = vadd.f32 %v1049_v1, %v997_v3  ;;  %v999_v9 = vadd.f32 %v998_v4, %v1974_v19  ;;  %v1068_v12 = vmax.f32 %v1048_v2, 0.0 }
 0x148   :  { %v1000_v10 = vpop.f32.mrf.mxu0 }
 0x149   :  { %v1053_v11 = vpop.f32.mrf.mxu1  ;;  %v1069_v13 = vmax.f32 %v1050_v8, 0.0  ;;  %v1052_v14 = vadd.f32 %v1051_v7, %v999_v9  ;;  %v1001_v16 = vadd.f32 %v1000_v10, %v1974_v19 }
 0x14a   :  { %v1004_v17 = vpop.f32.mrf.mxu0 }
 0x14b   :  { %v1057_v18 = vpop.f32.mrf.mxu1  ;;  %v1287_v20 = vpack.c.bf16 %v1069_v13, %v1068_v12  ;;  %v1054_v21 = vadd.f32 %v1053_v11, %v1001_v16  ;;  %v1005_v22 = vadd.f32 %v1004_v17, %v167_v36  ;;  %v1072_v15 = vmax.f32 %v1052_v14, 0.0 }
 0x14c   :  { %v1006_v5 = vpop.f32.mrf.mxu0 }
 0x14d   :  { %v1059_v23 = vpop.f32.mrf.mxu1  ;;  %1131 = vst [vmem:[%s2007_s3 + $0x8] sm:$0xff] %v1287_v20  ;;  %v1073_v6 = vmax.f32 %v1054_v21, 0.0  ;;  %v1058_v24 = vadd.f32 %v1057_v18, %v1005_v22  ;;  %v1007_v25 = vadd.f32 %v1006_v5, %v167_v36 }
 0x14e   :  { %v1008_v26 = vpop.f32.mrf.mxu0 }
 0x14f   :  { %v1061_v27 = vpop.f32.mrf.mxu1  ;;  %v1289_v28 = vpack.c.bf16 %v1073_v6, %v1072_v15  ;;  %v1060_v29 = vadd.f32 %v1059_v23, %v1007_v25  ;;  %v1009_v19 = vadd.f32 %v1008_v26, %v172_v41  ;;  %v1076_v31 = vmax.f32 %v1058_v24, 0.0 }
 0x150   :  { %v1010_v30 = vpop.f32.mrf.mxu0 }
 0x151   :  { %1133 = vst [vmem:[%s2007_s3 + $0x18] sm:$0xff] %v1289_v28  ;;  %v1077_v32 = vmax.f32 %v1060_v29, 0.0  ;;  %v1062_v33 = vadd.f32 %v1061_v27, %v1009_v19  ;;  %v1011_v34 = vadd.f32 %v1010_v30, %v172_v41  ;;  %v1063_v35 = vpop.f32.mrf.mxu1 }
 0x153   :  { %v1291_v37 = vpack.c.bf16 %v1077_v32, %v1076_v31  ;;  %v1064_v38 = vadd.f32 %v1063_v35, %v1011_v34  ;;  %v1080_v36 = vmax.f32 %v1062_v33, 0.0 }
 0x155   :  { %1135 = vst [vmem:[%s2007_s3 + $0x28] sm:$0xff] %v1291_v37  ;;  %v1081_v39 = vmax.f32 %v1064_v38, 0.0 }
 0x157   :  { %v1293_v40 = vpack.c.bf16 %v1081_v39, %v1080_v36 }
 0x159   :  { %1137 = vst [vmem:[%s2007_s3 + $0x38] sm:$0xff] %v1293_v40 }

// kernel: conv_encoder_forward.7
= control target key start
LH: loop header
LB: loop body
LE: loop exit
PB: predicated region body
PF: predicated region fallthrough
CT: control target
= control target key end

     0   :  { %v823_v1 = vmov 0   ;;  %s1024_s1 = inlined_call_operand.vmem [shape: bf16[512,128], index: 1, kind: input, shape index: {}]   ;;  %s1025_s0 = inlined_call_operand.vmem [shape: bf16[64,512], index: 0, kind: input, shape index: {}]   ;;  %s1026_s2 = inlined_call_operand.vmem [shape: f32[64,1], index: 2, kind: input, shape index: {}]   ;;  %s1027_s3 = inlined_call_operand.vmem [shape: bf16[64,128], index: 3, kind: output, shape index: {}]  }
   0x1   :  { %v767_v0 = vld [vmem:[%s1024_s1 + $0x78] sm:$0xff]   ;;  %765 = vset.pattern.permute.xlu0 %v823_v1  ;;  %766 = vset.pattern.permute.xlu1 %v823_v1  ;;  %v771_v5 = vld [vmem:[%s1024_s1 + $0x70] sm:$0xff]   ;;  %v775_v9 = vld [vmem:[%s1024_s1 + $0x68] sm:$0xff]  }
   0x2   :  { %v768_v2 = vld [vmem:[%s1024_s1 + $0xf8] sm:$0xff]   ;;  %684 = vmatprep.subr.bf16.mxu0 %v767_v0  ;;  %v772_v6 = vld [vmem:[%s1024_s1 + $0xf0] sm:$0xff]   ;;  %v776_v10 = vld [vmem:[%s1024_s1 + $0xe8] sm:$0xff]  }
   0x3   :  { %v769_v3 = vld [vmem:[%s1024_s1 + $0x38] sm:$0xff]   ;;  %724 = vmatprep.subr.bf16.mxu1 %v768_v2  ;;  %v773_v7 = vld [vmem:[%s1024_s1 + $0x30] sm:$0xff]   ;;  %v777_v11 = vld [vmem:[%s1024_s1 + $0x28] sm:$0xff]  }
   0x4   :  { %v770_v4 = vld [vmem:[%s1024_s1 + $0xb8] sm:$0xff]   ;;  %685 = vmatpush3.bf16.msra.mxu0 %v769_v3  ;;  %v774_v8 = vld [vmem:[%s1024_s1 + $0xb0] sm:$0xff]   ;;  %v778_v12 = vld [vmem:[%s1024_s1 + $0xa8] sm:$0xff]  }
   0x5   :  { %725 = vmatpush3.bf16.msra.mxu1 %v770_v4  ;;  %686 = vmatprep.subr.bf16.mxu0 %v771_v5  ;;  %v779_v13 = vld [vmem:[%s1024_s1 + $0x60] sm:$0xff]   ;;  %v783_v17 = vld [vmem:[%s1024_s1 + $0x58] sm:$0xff]   ;;  %v787_v21 = vld [vmem:[%s1024_s1 + $0x50] sm:$0xff]  }
   0x6   :  { %726 = vmatprep.subr.bf16.mxu1 %v772_v6  ;;  %v780_v14 = vld [vmem:[%s1024_s1 + $0xe0] sm:$0xff]   ;;  %v784_v18 = vld [vmem:[%s1024_s1 + $0xd8] sm:$0xff]   ;;  %v788_v22 = vld [vmem:[%s1024_s1 + $0xd0] sm:$0xff]  }
   0x7   :  { %v781_v15 = vld [vmem:[%s1024_s1 + $0x20] sm:$0xff]   ;;  %v785_v19 = vld [vmem:[%s1024_s1 + $0x18] sm:$0xff]   ;;  %v789_v23 = vld [vmem:[%s1024_s1 + $0x10] sm:$0xff]  }
   0x8   :  { %687 = vmatpush3.bf16.msra.mxu0 %v773_v7  ;;  %v782_v16 = vld [vmem:[%s1024_s1 + $0xa0] sm:$0xff]   ;;  %v786_v20 = vld [vmem:[%s1024_s1 + $0x98] sm:$0xff]   ;;  %v790_v24 = vld [vmem:[%s1024_s1 + $0x90] sm:$0xff]  }
   0x9   :  { %727 = vmatpush3.bf16.msra.mxu1 %v774_v8  ;;  %688 = vmatprep.subr.bf16.mxu0 %v775_v9  ;;  %v791_v25 = vld [vmem:[%s1024_s1 + $0x48] sm:$0xff]   ;;  %v795_v29 = vld [vmem:[%s1024_s1 + $0x40] sm:$0xff]   ;;  %v97_v44 = vld [vmem:[%s1026_s2 + $0x10] sm:$0xff] }
   0xa   :  { %728 = vmatprep.subr.bf16.mxu1 %v776_v10  ;;  %v792_v26 = vld [vmem:[%s1024_s1 + $0xc8] sm:$0xff]   ;;  %v796_v30 = vld [vmem:[%s1024_s1 + $0xc0] sm:$0xff]   ;;  %115 = vperm.xlu1 %766, %v97_v44   ;;  %v98_v46 = vld [vmem:[%s1026_s2 + $0x18] sm:$0xff] }
   0xb   :  { %v793_v27 = vld [vmem:[%s1024_s1 + $0x8] sm:$0xff]   ;;  %v797_v31 = vld [vmem:[%s1024_s1] sm:$0xff]   ;;  %v101_v53 = vld [vmem:[%s1026_s2 + $0x30] sm:$0xff] }
   0xc   :  { %689 = vmatpush3.bf16.msra.mxu0 %v777_v11  ;;  %v794_v28 = vld [vmem:[%s1024_s1 + $0x88] sm:$0xff]   ;;  %v798_v32 = vld [vmem:[%s1024_s1 + $0x80] sm:$0xff]   ;;  %v102_v54 = vld [vmem:[%s1026_s2 + $0x38] sm:$0xff] }
   0xd   :  { %729 = vmatpush3.bf16.msra.mxu1 %v778_v12  ;;  %690 = vmatprep.subr.bf16.mxu0 %v779_v13  ;;  %v799_v33 = vld [vmem:[%s1025_s0] ss:$16 sps:$4 sm:$0xff]   ;;  %v801_v34 = vld [vmem:[%s1025_s0 + $0x4] ss:$16 sps:$4 sm:$0xff]   ;;  %v802_v35 = vld [vmem:[%s1025_s0 + $0x8] ss:$16 sps:$4 sm:$0xff]  }
   0xe   :  { %730 = vmatprep.subr.bf16.mxu1 %v780_v14  ;;  %v804_v36 = vld [vmem:[%s1025_s0 + $0xc] ss:$16 sps:$4 sm:$0xff]   ;;  %447 = vmatprep.mubr.bf16.mxu0 %v801_v34  ;;  %v805_v37 = vld [vmem:[%s1025_s0 + $0x24] ss:$16 sps:$4 sm:$0xff]   ;;  %v809_v39 = vld [vmem:[%s1025_s0 + $0x20] ss:$16 sps:$4 sm:$0xff]  }
   0xf   :  { %512 = vmatprep.mubr.bf16.mxu1 %v804_v36  ;;  %v807_v38 = vld [vmem:[%s1025_s0 + $0x2c] ss:$16 sps:$4 sm:$0xff]   ;;  %v810_v40 = vld [vmem:[%s1025_s0 + $0x28] ss:$16 sps:$4 sm:$0xff]   ;;  %v811_v41 = vld [vmem:[%s1025_s0 + $0x44] ss:$16 sps:$4 sm:$0xff]   ;;  %120 = vperm.xlu1 %766, %v98_v46  }
  0x10   :  { %691 = vmatpush3.bf16.msra.mxu0 %v781_v15  ;;  %v813_v42 = vld [vmem:[%s1025_s0 + $0x4c] ss:$16 sps:$4 sm:$0xff]   ;;  %v95_v43 = vld [vmem:[%s1026_s2] sm:$0xff]  ;;  %v816_v49 = vld [vmem:[%s1025_s0 + $0x48] ss:$16 sps:$4 sm:$0xff]  }
  0x11   :  { %731 = vmatpush3.bf16.msra.mxu1 %v782_v16  ;;  %692 = vmatprep.subr.bf16.mxu0 %v783_v17  ;;  %v96_v45 = vld [vmem:[%s1026_s2 + $0x8] sm:$0xff]  ;;  %v815_v47 = vld [vmem:[%s1025_s0 + $0x40] ss:$16 sps:$4 sm:$0xff]   ;;  %v817_v50 = vld [vmem:[%s1025_s0 + $0x64] ss:$16 sps:$4 sm:$0xff]  }
  0x12   :  { %732 = vmatprep.subr.bf16.mxu1 %v784_v18  ;;  %105 = vperm.xlu0 %765, %v95_v43   ;;  %v99_v48 = vld [vmem:[%s1026_s2 + $0x20] sm:$0xff]  ;;  %v100_v51 = vld [vmem:[%s1026_s2 + $0x28] sm:$0xff] }
  0x13   :  { %v819_v52 = vld [vmem:[%s1025_s0 + $0x6c] ss:$16 sps:$4 sm:$0xff]   ;;  %130 = vperm.xlu1 %766, %v100_v51   ;;  %v821_v55 = vld [vmem:[%s1025_s0 + $0x60] ss:$16 sps:$4 sm:$0xff]   ;;  %v822_v56 = vld [vmem:[%s1025_s0 + $0x68] ss:$16 sps:$4 sm:$0xff]  }
  0x14   :  { %693 = vmatpush3.bf16.msra.mxu0 %v785_v19 }
  0x15   :  { %733 = vmatpush3.bf16.msra.mxu1 %v786_v20  ;;  %694 = vmatprep.subr.bf16.mxu0 %v787_v21 }
  0x16   :  { %734 = vmatprep.subr.bf16.mxu1 %v788_v22  ;;  %110 = vperm.xlu0 %765, %v96_v45  }
  0x17   :  { %140 = vperm.xlu1 %766, %v102_v54  }
  0x18   :  { %695 = vmatpush3.bf16.msra.mxu0 %v789_v23 }
  0x19   :  { %735 = vmatpush3.bf16.msra.mxu1 %v790_v24  ;;  %696 = vmatprep.subr.bf16.mxu0 %v791_v25 }
  0x1a   :  { %736 = vmatprep.subr.bf16.mxu1 %v792_v26  ;;  %125 = vperm.xlu0 %765, %v99_v48  }
  0x1c   :  { %697 = vmatpush3.bf16.msra.mxu0 %v793_v27 }
  0x1d   :  { %737 = vmatpush3.bf16.msra.mxu1 %v794_v28  ;;  %698 = vmatprep.subr.bf16.mxu0 %v795_v29 }
  0x1e   :  { %738 = vmatprep.subr.bf16.mxu1 %v796_v30  ;;  %135 = vperm.xlu0 %765, %v101_v53  }
  0x20   :  { %699 = vmatpush3.bf16.msra.mxu0 %v797_v31 }
  0x21   :  { %739 = vmatpush3.bf16.msra.mxu1 %v798_v32 }
  0x23   :  { %448 = vmatmul.mubr.bf16.vlgmr.msra.gmra.mxu0 %v799_v33 }
  0x24   :  { %513 = vmatmul.mubr.bf16.vlgmr.msra.gmra.mxu1 %v802_v35  ;;  %455 = vmatprep.mubr.bf16.mxu0 %v805_v37 }
  0x25   :  { %520 = vmatprep.mubr.bf16.mxu1 %v807_v38 }
  0x2b   :  { %456 = vmatmul.mubr.bf16.gmra.mxu0 %v809_v39 }
  0x2c   :  { %521 = vmatmul.mubr.bf16.gmra.mxu1 %v810_v40  ;;  %463 = vmatprep.mubr.bf16.mxu0 %v811_v41 }
  0x2d   :  { %528 = vmatprep.mubr.bf16.mxu1 %v813_v42 }
  0x33   :  { %464 = vmatmul.mubr.bf16.gmra.mxu0 %v815_v47 }
  0x34   :  { %529 = vmatmul.mubr.bf16.gmra.mxu1 %v816_v49  ;;  %471 = vmatprep.mubr.bf16.mxu0 %v817_v50 }
  0x35   :  { %536 = vmatprep.mubr.bf16.mxu1 %v819_v52 }
  0x3b   :  { %472 = vmatmul.mubr.bf16.gmra.mxu0 %v821_v55 }
  0x3c   :  { %537 = vmatmul.mubr.bf16.gmra.mxu1 %v822_v56 }
  0x85   :  { %v116_v12 = vpop.permute.xlu1 %115 }
  0x8a   :  { %v121_v27 = vpop.permute.xlu1 %120 }
  0x8d   :  { %v106_v58 = vpop.permute.xlu0 %105 }
  0x8e   :  { %v131_v48 = vpop.permute.xlu1 %130 }
  0x91   :  { %v111_v3 = vpop.permute.xlu0 %110 }
  0x95   :  { %v126_v37 = vpop.permute.xlu0 %125 }
  0xe3   :  { %v700_v57 = vpop.f32.mrf.mxu0 }
  0xe4   :  { %v740_v59 = vpop.f32.mrf.mxu1 }
  0xe5   :  { %v701_v60 = vpop.f32.mrf.mxu0 }
  0xe6   :  { %v702_v61 = vadd.f32 %v701_v60, %v700_v57  ;;  %v741_v62 = vpop.f32.mrf.mxu1 }
  0xe7   :  { %v703_v63 = vpop.f32.mrf.mxu0  ;;  %v742_v4 = vadd.f32 %v741_v62, %v740_v59 }
  0xe8   :  { %v450_v0 = vadd.f32 %v702_v61, %v106_v58  ;;  %v743_v1 = vpop.f32.mrf.mxu1  ;;  %v136_v58 = vpop.permute.xlu0 %135 }
  0xe9   :  { %v704_v2 = vpop.f32.mrf.mxu0 }
  0xea   :  { %v705_v5 = vadd.f32 %v704_v2, %v703_v63  ;;  %v744_v6 = vpop.f32.mrf.mxu1  ;;  %v515_v8 = vadd.f32 %v742_v4, %v450_v0 }
  0xeb   :  { %v706_v7 = vpop.f32.mrf.mxu0  ;;  %v745_v9 = vadd.f32 %v744_v6, %v743_v1 }
  0xec   :  { %v453_v10 = vadd.f32 %v705_v5, %v111_v3  ;;  %v746_v11 = vpop.f32.mrf.mxu1  ;;  %v545_v18 = vmax.f32 %v515_v8, 0.0  ;;  %v141_v5 = vpop.permute.xlu1 %140 }
  0xed   :  { %v707_v13 = vpop.f32.mrf.mxu0 }
  0xee   :  { %v518_v14 = vadd.f32 %v745_v9, %v453_v10  ;;  %v708_v15 = vadd.f32 %v707_v13, %v706_v7  ;;  %v747_v16 = vpop.f32.mrf.mxu1 }
  0xef   :  { %v709_v17 = vpop.f32.mrf.mxu0  ;;  %v748_v24 = vadd.f32 %v747_v16, %v746_v11 }
  0xf0   :  { %v546_v19 = vmax.f32 %v518_v14, 0.0  ;;  %v458_v20 = vadd.f32 %v708_v15, %v116_v12  ;;  %v749_v21 = vpop.f32.mrf.mxu1 }
  0xf1   :  { %v710_v22 = vpop.f32.mrf.mxu0 }
  0xf2   :  { %v664_v23 = vpack.c.bf16 %v546_v19, %v545_v18  ;;  %v711_v25 = vadd.f32 %v710_v22, %v709_v17  ;;  %v750_v26 = vpop.f32.mrf.mxu1  ;;  %v523_v29 = vadd.f32 %v748_v24, %v458_v20 }
  0xf3   :  { %v712_v28 = vpop.f32.mrf.mxu0  ;;  %v751_v31 = vadd.f32 %v750_v26, %v749_v21 }
  0xf4   :  { %665 = vst [vmem:[%s1027_s3] sm:$0xff] %v664_v23   ;;  %v461_v30 = vadd.f32 %v711_v25, %v121_v27  ;;  %v752_v32 = vpop.f32.mrf.mxu1  ;;  %v547_v39 = vmax.f32 %v523_v29, 0.0 }
  0xf5   :  { %v713_v33 = vpop.f32.mrf.mxu0 }
  0xf6   :  { %v526_v34 = vadd.f32 %v751_v31, %v461_v30  ;;  %v714_v35 = vadd.f32 %v713_v33, %v712_v28  ;;  %v753_v36 = vpop.f32.mrf.mxu1 }
  0xf7   :  { %v715_v38 = vpop.f32.mrf.mxu0  ;;  %v754_v45 = vadd.f32 %v753_v36, %v752_v32 }
  0xf8   :  { %v548_v40 = vmax.f32 %v526_v34, 0.0  ;;  %v466_v41 = vadd.f32 %v714_v35, %v126_v37  ;;  %v755_v42 = vpop.f32.mrf.mxu1 }
  0xf9   :  { %v716_v43 = vpop.f32.mrf.mxu0 }
  0xfa   :  { %v669_v44 = vpack.c.bf16 %v548_v40, %v547_v39  ;;  %v717_v46 = vadd.f32 %v716_v43, %v715_v38  ;;  %v756_v47 = vpop.f32.mrf.mxu1  ;;  %v531_v50 = vadd.f32 %v754_v45, %v466_v41 }
  0xfb   :  { %v718_v49 = vpop.f32.mrf.mxu0  ;;  %v757_v52 = vadd.f32 %v756_v47, %v755_v42 }
  0xfc   :  { %681 = vst [vmem:[%s1027_s3 + $0x8] sm:$0xff] %v669_v44   ;;  %v469_v51 = vadd.f32 %v717_v46, %v131_v48  ;;  %v758_v53 = vpop.f32.mrf.mxu1  ;;  %v549_v60 = vmax.f32 %v531_v50, 0.0 }
  0xfd   :  { %v719_v54 = vpop.f32.mrf.mxu0 }
  0xfe   :  { %v534_v55 = vadd.f32 %v757_v52, %v469_v51  ;;  %v720_v56 = vadd.f32 %v719_v54, %v718_v49  ;;  %v759_v57 = vpop.f32.mrf.mxu1 }
  0xff   :  { %v721_v59 = vpop.f32.mrf.mxu0  ;;  %v760_v2 = vadd.f32 %v759_v57, %v758_v53 }
 0x100   :  { %v550_v61 = vmax.f32 %v534_v55, 0.0  ;;  %v474_v62 = vadd.f32 %v720_v56, %v136_v58  ;;  %v761_v63 = vpop.f32.mrf.mxu1 }
 0x101   :  { %v722_v0 = vpop.f32.mrf.mxu0 }
 0x102   :  { %v674_v1 = vpack.c.bf16 %v550_v61, %v549_v60  ;;  %v723_v3 = vadd.f32 %v722_v0, %v721_v59  ;;  %v762_v4 = vpop.f32.mrf.mxu1  ;;  %v539_v6 = vadd.f32 %v760_v2, %v474_v62 }
 0x103   :  { %v763_v8 = vadd.f32 %v762_v4, %v761_v63 }
 0x104   :  { %682 = vst [vmem:[%s1027_s3 + $0x10] sm:$0xff] %v674_v1   ;;  %v477_v7 = vadd.f32 %v723_v3, %v141_v5  ;;  %v551_v10 = vmax.f32 %v539_v6, 0.0 }
 0x106   :  { %v542_v9 = vadd.f32 %v763_v8, %v477_v7 }
 0x108   :  { %v552_v11 = vmax.f32 %v542_v9, 0.0 }
 0x10a   :  { %v679_v12 = vpack.c.bf16 %v552_v11, %v551_v10 }
 0x10c   :  { %683 = vst [vmem:[%s1027_s3 + $0x18] sm:$0xff] %v679_v12  }

// kernel: conv_encoder_forward.8
= control target key start
LH: loop header
LB: loop body
LE: loop exit
PB: predicated region body
PF: predicated region fallthrough
CT: control target
= control target key end

     0   :  { %v1419_v1 = vmov 0   ;;  %vm1067_vm0 = vcmask 257024   ;;  %s1829_s1 = inlined_call_operand.vmem [shape: bf16[1024,32], index: 1, kind: input, shape index: {}]   ;;  %s1830_s0 = inlined_call_operand.vmem [shape: bf16[64,1024], index: 0, kind: input, shape index: {}]   ;;  %s1831_s2 = inlined_call_operand.vmem [shape: f32[64,1], index: 2, kind: input, shape index: {}]   ;;  %s1832_s3 = inlined_call_operand.vmem [shape: bf16[64,32], index: 3, kind: output, shape index: {}]  }
   0x1   :  { %v1355_v0 = vld [vmem:[%s1829_s1 + $0x78] sm:$0xff]   ;;  %1353 = vset.pattern.permute.xlu0 %v1419_v1  ;;  %1354 = vset.pattern.permute.xlu1 %v1419_v1  ;;  %v1359_v5 = vld [vmem:[%s1829_s1 + $0x70] sm:$0xff]   ;;  %v1363_v9 = vld [vmem:[%s1829_s1 + $0x68] sm:$0xff]  }
   0x2   :  { %v1356_v2 = vld [vmem:[%s1829_s1 + $0xf8] sm:$0xff]   ;;  %1192 = vmatprep.subr.bf16.mxu0 %v1355_v0  ;;  %v1360_v6 = vld [vmem:[%s1829_s1 + $0xf0] sm:$0xff]   ;;  %v1364_v10 = vld [vmem:[%s1829_s1 + $0xe8] sm:$0xff]  }
   0x3   :  { %v1357_v3 = vld [vmem:[%s1829_s1 + $0x38] sm:$0xff]   ;;  %1232 = vmatprep.subr.bf16.mxu1 %v1356_v2  ;;  %v1361_v7 = vld [vmem:[%s1829_s1 + $0x30] sm:$0xff]   ;;  %v1365_v11 = vld [vmem:[%s1829_s1 + $0x28] sm:$0xff]  }
   0x4   :  { %v1358_v4 = vld [vmem:[%s1829_s1 + $0xb8] sm:$0xff]   ;;  %1193 = vmatpush3.bf16.msra.mxu0 %v1357_v3  ;;  %v1362_v8 = vld [vmem:[%s1829_s1 + $0xb0] sm:$0xff]   ;;  %v1366_v12 = vld [vmem:[%s1829_s1 + $0xa8] sm:$0xff]  }
   0x5   :  { %1233 = vmatpush3.bf16.msra.mxu1 %v1358_v4  ;;  %1194 = vmatprep.subr.bf16.mxu0 %v1359_v5  ;;  %v1367_v13 = vld [vmem:[%s1829_s1 + $0x60] sm:$0xff]   ;;  %v1371_v17 = vld [vmem:[%s1829_s1 + $0x58] sm:$0xff]   ;;  %v1375_v21 = vld [vmem:[%s1829_s1 + $0x50] sm:$0xff]  }
   0x6   :  { %1234 = vmatprep.subr.bf16.mxu1 %v1360_v6  ;;  %v1368_v14 = vld [vmem:[%s1829_s1 + $0xe0] sm:$0xff]   ;;  %v1372_v18 = vld [vmem:[%s1829_s1 + $0xd8] sm:$0xff]   ;;  %v1376_v22 = vld [vmem:[%s1829_s1 + $0xd0] sm:$0xff]  }
   0x7   :  { %v1369_v15 = vld [vmem:[%s1829_s1 + $0x20] sm:$0xff]   ;;  %v1373_v19 = vld [vmem:[%s1829_s1 + $0x18] sm:$0xff]   ;;  %v1377_v23 = vld [vmem:[%s1829_s1 + $0x10] sm:$0xff]  }
   0x8   :  { %1195 = vmatpush3.bf16.msra.mxu0 %v1361_v7  ;;  %v1370_v16 = vld [vmem:[%s1829_s1 + $0xa0] sm:$0xff]   ;;  %v1374_v20 = vld [vmem:[%s1829_s1 + $0x98] sm:$0xff]   ;;  %v1378_v24 = vld [vmem:[%s1829_s1 + $0x90] sm:$0xff]  }
   0x9   :  { %1235 = vmatpush3.bf16.msra.mxu1 %v1362_v8  ;;  %1196 = vmatprep.subr.bf16.mxu0 %v1363_v9  ;;  %v1379_v25 = vld [vmem:[%s1829_s1 + $0x48] sm:$0xff]   ;;  %v1383_v29 = vld [vmem:[%s1829_s1 + $0x40] sm:$0xff]   ;;  %v1387_v41 = vld [vmem:[%s1829_s1 + $0x178] sm:$0xff]  }
   0xa   :  { %1236 = vmatprep.subr.bf16.mxu1 %v1364_v10  ;;  %v1380_v26 = vld [vmem:[%s1829_s1 + $0xc8] sm:$0xff]   ;;  %v1384_v30 = vld [vmem:[%s1829_s1 + $0xc0] sm:$0xff]   ;;  %v1388_v42 = vld [vmem:[%s1829_s1 + $0x1f8] sm:$0xff]  }
   0xb   :  { %v1381_v27 = vld [vmem:[%s1829_s1 + $0x8] sm:$0xff]   ;;  %v1385_v31 = vld [vmem:[%s1829_s1] sm:$0xff]   ;;  %v1389_v43 = vld [vmem:[%s1829_s1 + $0x138] sm:$0xff]  }
   0xc   :  { %1197 = vmatpush3.bf16.msra.mxu0 %v1365_v11  ;;  %v1382_v28 = vld [vmem:[%s1829_s1 + $0x88] sm:$0xff]   ;;  %v1386_v32 = vld [vmem:[%s1829_s1 + $0x80] sm:$0xff]   ;;  %v1390_v44 = vld [vmem:[%s1829_s1 + $0x1b8] sm:$0xff]  }
   0xd   :  { %1237 = vmatpush3.bf16.msra.mxu1 %v1366_v12  ;;  %1198 = vmatprep.subr.bf16.mxu0 %v1367_v13  ;;  %v15_v33 = vld [vmem:[%s1830_s0] sm:$0xff]  ;;  %v16_v35 = vld [vmem:[%s1830_s0 + $0x8] sm:$0xff]  ;;  %v1391_v45 = vld [vmem:[%s1829_s1 + $0x170] sm:$0xff]  }
   0xe   :  { %1238 = vmatprep.subr.bf16.mxu1 %v1368_v14  ;;  %v19_v34 = vld [vmem:[%s1830_s0 + $0x20] sm:$0xff]  ;;  %v20_v38 = vld [vmem:[%s1830_s0 + $0x28] sm:$0xff]  ;;  %v1392_v46 = vld [vmem:[%s1829_s1 + $0x1f0] sm:$0xff]  }
   0xf   :  { %v1080_v36 = vcombine.low %v15_v33, %v19_v34  ;;  %v1081_v37 = vcombine.high %v15_v33, %v19_v34  ;;  %v1082_v39 = vcombine.low %v16_v35, %v20_v38  ;;  %v1083_v40 = vcombine.high %v16_v35, %v20_v38  ;;  %v1393_v47 = vld [vmem:[%s1829_s1 + $0x130] sm:$0xff]   ;;  %v23_v49 = vld [vmem:[%s1830_s0 + $0x40] sm:$0xff]  ;;  %v24_v52 = vld [vmem:[%s1830_s0 + $0x48] sm:$0xff] }
  0x10   :  { %1199 = vmatpush3.bf16.msra.mxu0 %v1369_v15  ;;  %v1394_v48 = vld [vmem:[%s1829_s1 + $0x1b0] sm:$0xff]   ;;  %v27_v50 = vld [vmem:[%s1830_s0 + $0x60] sm:$0xff]  ;;  %v28_v53 = vld [vmem:[%s1830_s0 + $0x68] sm:$0xff] }
  0x11   :  { %1239 = vmatpush3.bf16.msra.mxu1 %v1370_v16  ;;  %1200 = vmatprep.subr.bf16.mxu0 %v1371_v17  ;;  %v1089_v51 = vcombine.high %v23_v49, %v27_v50  ;;  %v1088_v54 = vcombine.low %v23_v49, %v27_v50  ;;  %v1091_v55 = vcombine.high %v24_v52, %v28_v53  ;;  %v1395_v57 = vld [vmem:[%s1829_s1 + $0x168] sm:$0xff]   ;;  %v1399_v61 = vld [vmem:[%s1829_s1 + $0x160] sm:$0xff]   ;;  %v1403_v9 = vld [vmem:[%s1829_s1 + $0x158] sm:$0xff]  }
  0x12   :  { %1240 = vmatprep.subr.bf16.mxu1 %v1372_v18  ;;  %799 = vmatprep.mubr.bf16.mxu0 %v1081_v37  ;;  %v1090_v56 = vcombine.low %v24_v52, %v28_v53  ;;  %v1396_v58 = vld [vmem:[%s1829_s1 + $0x1e8] sm:$0xff]   ;;  %v1400_v62 = vld [vmem:[%s1829_s1 + $0x1e0] sm:$0xff]   ;;  %v1404_v10 = vld [vmem:[%s1829_s1 + $0x1d8] sm:$0xff]  }
  0x13   :  { %864 = vmatprep.mubr.bf16.mxu1 %v1083_v40  ;;  %v1397_v59 = vld [vmem:[%s1829_s1 + $0x128] sm:$0xff]   ;;  %v1401_v63 = vld [vmem:[%s1829_s1 + $0x120] sm:$0xff]   ;;  %v1405_v11 = vld [vmem:[%s1829_s1 + $0x118] sm:$0xff]  }
  0x14   :  { %1201 = vmatpush3.bf16.msra.mxu0 %v1373_v19  ;;  %v1398_v60 = vld [vmem:[%s1829_s1 + $0x1a8] sm:$0xff]   ;;  %v1402_v0 = vld [vmem:[%s1829_s1 + $0x1a0] sm:$0xff]   ;;  %v1406_v12 = vld [vmem:[%s1829_s1 + $0x198] sm:$0xff]  }
  0x15   :  { %1241 = vmatpush3.bf16.msra.mxu1 %v1374_v20  ;;  %1202 = vmatprep.subr.bf16.mxu0 %v1375_v21  ;;  %v31_v1 = vld [vmem:[%s1830_s0 + $0x80] sm:$0xff]  ;;  %v32_v3 = vld [vmem:[%s1830_s0 + $0x88] sm:$0xff]  ;;  %v1407_v13 = vld [vmem:[%s1829_s1 + $0x150] sm:$0xff]  }
  0x16   :  { %1242 = vmatprep.subr.bf16.mxu1 %v1376_v22  ;;  %v35_v2 = vld [vmem:[%s1830_s0 + $0xa0] sm:$0xff]  ;;  %v36_v4 = vld [vmem:[%s1830_s0 + $0xa8] sm:$0xff]  ;;  %v1408_v14 = vld [vmem:[%s1829_s1 + $0x1d0] sm:$0xff]  }
  0x17   :  { %v1097_v5 = vcombine.high %v31_v1, %v35_v2  ;;  %v1099_v6 = vcombine.high %v32_v3, %v36_v4  ;;  %v1096_v7 = vcombine.low %v31_v1, %v35_v2  ;;  %v1098_v8 = vcombine.low %v32_v3, %v36_v4  ;;  %v1409_v15 = vld [vmem:[%s1829_s1 + $0x110] sm:$0xff]   ;;  %v39_v17 = vld [vmem:[%s1830_s0 + $0xc0] sm:$0xff]  ;;  %v40_v19 = vld [vmem:[%s1830_s0 + $0xc8] sm:$0xff] }
  0x18   :  { %1203 = vmatpush3.bf16.msra.mxu0 %v1377_v23  ;;  %v1410_v16 = vld [vmem:[%s1829_s1 + $0x190] sm:$0xff]   ;;  %v43_v18 = vld [vmem:[%s1830_s0 + $0xe0] sm:$0xff]  ;;  %v44_v21 = vld [vmem:[%s1830_s0 + $0xe8] sm:$0xff] }
  0x19   :  { %1243 = vmatpush3.bf16.msra.mxu1 %v1378_v24  ;;  %1204 = vmatprep.subr.bf16.mxu0 %v1379_v25  ;;  %v1105_v20 = vcombine.high %v39_v17, %v43_v18  ;;  %v1104_v22 = vcombine.low %v39_v17, %v43_v18  ;;  %v1107_v23 = vcombine.high %v40_v19, %v44_v21  ;;  %v1411_v25 = vld [vmem:[%s1829_s1 + $0x148] sm:$0xff]   ;;  %v17_v33 = vld [vmem:[%s1830_s0 + $0x10] sm:$0xff]  ;;  %v18_v37 = vld [vmem:[%s1830_s0 + $0x18] sm:$0xff] }
  0x1a   :  { %1244 = vmatprep.subr.bf16.mxu1 %v1380_v26  ;;  %v1106_v24 = vcombine.low %v40_v19, %v44_v21  ;;  %v1412_v26 = vld [vmem:[%s1829_s1 + $0x1c8] sm:$0xff]   ;;  %v21_v34 = vld [vmem:[%s1830_s0 + $0x30] sm:$0xff]  ;;  %v22_v38 = vld [vmem:[%s1830_s0 + $0x38] sm:$0xff] }
  0x1b   :  { %v1084_v35 = vcombine.low %v17_v33, %v21_v34  ;;  %v1086_v40 = vcombine.low %v18_v37, %v22_v38  ;;  %v37_v49 = vld [vmem:[%s1830_s0 + $0xb0] sm:$0xff]  ;;  %v38_v52 = vld [vmem:[%s1830_s0 + $0xb8] sm:$0xff]  ;;  %v176_v53 = vld [vmem:[%s1831_s2 + $0x8] sm:$0xff] }
  0x1c   :  { %1205 = vmatpush3.bf16.msra.mxu0 %v1381_v27  ;;  %v1413_v27 = vld [vmem:[%s1829_s1 + $0x108] sm:$0xff]   ;;  %v177_v50 = vld [vmem:[%s1831_s2 + $0x10] sm:$0xff]  ;;  %v182_v3 = vld [vmem:[%s1831_s2 + $0x38] sm:$0xff] }
  0x1d   :  { %1245 = vmatpush3.bf16.msra.mxu1 %v1382_v28  ;;  %1206 = vmatprep.subr.bf16.mxu0 %v1383_v29  ;;  %v1414_v28 = vld [vmem:[%s1829_s1 + $0x188] sm:$0xff]   ;;  %v1415_v29 = vld [vmem:[%s1829_s1 + $0x140] sm:$0xff]   ;;  %v181_v1 = vld [vmem:[%s1831_s2 + $0x30] sm:$0xff] }
  0x1e   :  { %1246 = vmatprep.subr.bf16.mxu1 %v1384_v30  ;;  %v1416_v30 = vld [vmem:[%s1829_s1 + $0x1c0] sm:$0xff]   ;;  %195 = vperm.xlu1 %1354, %v177_v50  }
  0x20   :  { %1207 = vmatpush3.bf16.msra.mxu0 %v1385_v31  ;;  %v1417_v31 = vld [vmem:[%s1829_s1 + $0x100] sm:$0xff]  }
  0x21   :  { %1247 = vmatpush3.bf16.msra.mxu1 %v1386_v32  ;;  %1272 = vmatprep.subr.bf16.mxu0 %v1387_v41  ;;  %v1418_v32 = vld [vmem:[%s1829_s1 + $0x180] sm:$0xff]   ;;  %v1087_v41 = vcombine.high %v18_v37, %v22_v38 }
  0x22   :  { %1312 = vmatprep.subr.bf16.mxu1 %v1388_v42  ;;  %v29_v42 = vld [vmem:[%s1830_s0 + $0x70] sm:$0xff] }
  0x23   :  { %800 = vmatmul.mubr.bf16.vlgmr.msra.gmra.mxu0 %v1080_v36  ;;  %v1085_v36 = vcombine.high %v17_v33, %v21_v34 }
  0x24   :  { %865 = vmatmul.mubr.bf16.vlgmr.msra.gmra.mxu1 %v1082_v39  ;;  %1273 = vmatpush3.bf16.msra.mxu0 %v1389_v43  ;;  %v25_v39 = vld [vmem:[%s1830_s0 + $0x50] sm:$0xff]  ;;  %v26_v43 = vld [vmem:[%s1830_s0 + $0x58] sm:$0xff] }
  0x25   :  { %1313 = vmatpush3.bf16.msra.mxu1 %v1390_v44  ;;  %1274 = vmatprep.subr.bf16.mxu0 %v1391_v45  ;;  %v30_v44 = vld [vmem:[%s1830_s0 + $0x78] sm:$0xff]  ;;  %v1093_v45 = vcombine.high %v25_v39, %v29_v42 }
  0x26   :  { %1314 = vmatprep.subr.bf16.mxu1 %v1392_v46  ;;  %807 = vmatprep.mubr.bf16.mxu0 %v1089_v51  ;;  %v1095_v46 = vcombine.high %v26_v43, %v30_v44  ;;  %v34_v51 = vld [vmem:[%s1830_s0 + $0x98] sm:$0xff] }
  0x27   :  { %872 = vmatprep.mubr.bf16.mxu1 %v1091_v55  ;;  %v178_v55 = vld [vmem:[%s1831_s2 + $0x18] sm:$0xff]  ;;  %v1102_v4 = vcombine.low %v34_v51, %v38_v52 }
  0x28   :  { %1275 = vmatpush3.bf16.msra.mxu0 %v1393_v47  ;;  %v175_v47 = vld [vmem:[%s1831_s2] sm:$0xff]  ;;  %200 = vperm.xlu1 %1354, %v178_v55  }
  0x29   :  { %1315 = vmatpush3.bf16.msra.mxu1 %v1394_v48  ;;  %1276 = vmatprep.subr.bf16.mxu0 %v1395_v57  ;;  %v33_v48 = vld [vmem:[%s1830_s0 + $0x90] sm:$0xff] }
  0x2a   :  { %1316 = vmatprep.subr.bf16.mxu1 %v1396_v58  ;;  %185 = vperm.xlu0 %1353, %v175_v47   ;;  %v1101_v57 = vcombine.high %v33_v48, %v37_v49  ;;  %v1103_v58 = vcombine.high %v34_v51, %v38_v52  ;;  %v1100_v2 = vcombine.low %v33_v48, %v37_v49 }
  0x2b   :  { %808 = vmatmul.mubr.bf16.gmra.mxu0 %v1088_v54  ;;  %v1092_v54 = vcombine.low %v25_v39, %v29_v42 }
  0x2c   :  { %873 = vmatmul.mubr.bf16.gmra.mxu1 %v1090_v56  ;;  %1277 = vmatpush3.bf16.msra.mxu0 %v1397_v59  ;;  %v1094_v56 = vcombine.low %v26_v43, %v30_v44  ;;  %v179_v59 = vld [vmem:[%s1831_s2 + $0x20] sm:$0xff] }
  0x2d   :  { %1317 = vmatpush3.bf16.msra.mxu1 %v1398_v60  ;;  %1278 = vmatprep.subr.bf16.mxu0 %v1399_v61  ;;  %v180_v60 = vld [vmem:[%s1831_s2 + $0x28] sm:$0xff]  ;;  %v41_v61 = vld [vmem:[%s1830_s0 + $0xd0] sm:$0xff] }
  0x2e   :  { %1318 = vmatprep.subr.bf16.mxu1 %v1400_v62  ;;  %815 = vmatprep.mubr.bf16.mxu0 %v1097_v5  ;;  %v45_v62 = vld [vmem:[%s1830_s0 + $0xf0] sm:$0xff] }
  0x2f   :  { %880 = vmatprep.mubr.bf16.mxu1 %v1099_v6  ;;  %190 = vperm.xlu0 %1353, %v176_v53   ;;  %v1109_v5 = vcombine.high %v41_v61, %v45_v62 }
  0x30   :  { %1279 = vmatpush3.bf16.msra.mxu0 %v1401_v63  ;;  %v42_v63 = vld [vmem:[%s1830_s0 + $0xd8] sm:$0xff]  ;;  %210 = vperm.xlu1 %1354, %v180_v60  }
  0x31   :  { %1319 = vmatpush3.bf16.msra.mxu1 %v1402_v0  ;;  %1280 = vmatprep.subr.bf16.mxu0 %v1403_v9  ;;  %v46_v0 = vld [vmem:[%s1830_s0 + $0xf8] sm:$0xff] }
  0x32   :  { %1320 = vmatprep.subr.bf16.mxu1 %v1404_v10  ;;  %v1111_v6 = vcombine.high %v42_v63, %v46_v0 }
  0x33   :  { %816 = vmatmul.mubr.bf16.gmra.mxu0 %v1096_v7  ;;  %205 = vperm.xlu0 %1353, %v179_v59   ;;  %v1108_v7 = vcombine.low %v41_v61, %v45_v62 }
  0x34   :  { %881 = vmatmul.mubr.bf16.gmra.mxu1 %v1098_v8  ;;  %1281 = vmatpush3.bf16.msra.mxu0 %v1405_v11  ;;  %v1110_v8 = vcombine.low %v42_v63, %v46_v0 }
  0x35   :  { %1321 = vmatpush3.bf16.msra.mxu1 %v1406_v12  ;;  %1282 = vmatprep.subr.bf16.mxu0 %v1407_v13 }
  0x36   :  { %1322 = vmatprep.subr.bf16.mxu1 %v1408_v14  ;;  %823 = vmatprep.mubr.bf16.mxu0 %v1105_v20 }
  0x37   :  { %888 = vmatprep.mubr.bf16.mxu1 %v1107_v23  ;;  %215 = vperm.xlu0 %1353, %v181_v1  }
  0x38   :  { %1283 = vmatpush3.bf16.msra.mxu0 %v1409_v15  ;;  %220 = vperm.xlu1 %1354, %v182_v3  }
  0x39   :  { %1323 = vmatpush3.bf16.msra.mxu1 %v1410_v16  ;;  %1284 = vmatprep.subr.bf16.mxu0 %v1411_v25 }
  0x3a   :  { %1324 = vmatprep.subr.bf16.mxu1 %v1412_v26 }
  0x3b   :  { %824 = vmatmul.mubr.bf16.gmra.mxu0 %v1104_v22 }
  0x3c   :  { %889 = vmatmul.mubr.bf16.gmra.mxu1 %v1106_v24  ;;  %1285 = vmatpush3.bf16.msra.mxu0 %v1413_v27 }
  0x3d   :  { %1325 = vmatpush3.bf16.msra.mxu1 %v1414_v28  ;;  %1286 = vmatprep.subr.bf16.mxu0 %v1415_v29 }
  0x3e   :  { %1326 = vmatprep.subr.bf16.mxu1 %v1416_v30  ;;  %929 = vmatprep.mubr.bf16.mxu0 %v1085_v36 }
  0x3f   :  { %994 = vmatprep.mubr.bf16.mxu1 %v1087_v41 }
  0x40   :  { %1287 = vmatpush3.bf16.msra.mxu0 %v1417_v31 }
  0x41   :  { %1327 = vmatpush3.bf16.msra.mxu1 %v1418_v32 }
  0x43   :  { %930 = vmatmul.mubr.bf16.vlgmr.msra.gmra.mxu0 %v1084_v35 }
  0x44   :  { %995 = vmatmul.mubr.bf16.vlgmr.msra.gmra.mxu1 %v1086_v40  ;;  %937 = vmatprep.mubr.bf16.mxu0 %v1093_v45 }
  0x45   :  { %1002 = vmatprep.mubr.bf16.mxu1 %v1095_v46 }
  0x4b   :  { %938 = vmatmul.mubr.bf16.gmra.mxu0 %v1092_v54 }
  0x4c   :  { %1003 = vmatmul.mubr.bf16.gmra.mxu1 %v1094_v56  ;;  %945 = vmatprep.mubr.bf16.mxu0 %v1101_v57 }
  0x4d   :  { %1010 = vmatprep.mubr.bf16.mxu1 %v1103_v58 }
  0x53   :  { %946 = vmatmul.mubr.bf16.gmra.mxu0 %v1100_v2 }
  0x54   :  { %1011 = vmatmul.mubr.bf16.gmra.mxu1 %v1102_v4  ;;  %953 = vmatprep.mubr.bf16.mxu0 %v1109_v5 }
  0x55   :  { %1018 = vmatprep.mubr.bf16.mxu1 %v1111_v6 }
  0x5b   :  { %954 = vmatmul.mubr.bf16.gmra.mxu0 %v1108_v7 }
  0x5c   :  { %1019 = vmatmul.mubr.bf16.gmra.mxu1 %v1110_v8 }
  0x99   :  { %v196_v48 = vpop.permute.xlu1 %195 }
  0xa3   :  { %v201_v1 = vpop.permute.xlu1 %200 }
  0xa5   :  { %v186_v36 = vpop.permute.xlu0 %185 }
  0xaa   :  { %v191_v45 = vpop.permute.xlu0 %190 }
  0xe3   :  { %v1208_v9 = vpop.f32.mrf.mxu0 }
  0xe4   :  { %v1248_v10 = vpop.f32.mrf.mxu1 }
  0xe5   :  { %v1209_v11 = vpop.f32.mrf.mxu0 }
  0xe6   :  { %v1249_v12 = vpop.f32.mrf.mxu1  ;;  %v1210_v38 = vadd.f32 %v1209_v11, %v1208_v9 }
  0xe7   :  { %v1211_v13 = vpop.f32.mrf.mxu0  ;;  %v1250_v47 = vadd.f32 %v1249_v12, %v1248_v10 }
  0xe8   :  { %v1251_v14 = vpop.f32.mrf.mxu1  ;;  %v802_v43 = vadd.f32 %v1210_v38, %v186_v36 }
  0xe9   :  { %v1212_v15 = vpop.f32.mrf.mxu0 }
  0xea   :  { %v1252_v16 = vpop.f32.mrf.mxu1  ;;  %v1213_v44 = vadd.f32 %v1212_v15, %v1211_v13  ;;  %v867_v52 = vadd.f32 %v1250_v47, %v802_v43 }
  0xeb   :  { %v1214_v17 = vpop.f32.mrf.mxu0  ;;  %v1253_v57 = vadd.f32 %v1252_v16, %v1251_v14 }
  0xec   :  { %v1254_v18 = vpop.f32.mrf.mxu1  ;;  %v805_v53 = vadd.f32 %v1213_v44, %v191_v45 }
  0xed   :  { %v1215_v19 = vpop.f32.mrf.mxu0 }
  0xee   :  { %v1255_v20 = vpop.f32.mrf.mxu1  ;;  %v1216_v50 = vadd.f32 %v1215_v19, %v1214_v17  ;;  %v870_v0 = vadd.f32 %v1253_v57, %v805_v53 }
  0xef   :  { %v1217_v21 = vpop.f32.mrf.mxu0  ;;  %v1256_v5 = vadd.f32 %v1255_v20, %v1254_v18 }
  0xf0   :  { %v1752_v22 = vpop.f32.mrf.mxu1  ;;  %v810_v61 = vadd.f32 %v1216_v50, %v196_v48 }
  0xf1   :  { %v1218_v23 = vpop.f32.mrf.mxu0 }
  0xf2   :  { %v1258_v24 = vpop.f32.mrf.mxu1  ;;  %v1219_v62 = vadd.f32 %v1218_v23, %v1217_v21  ;;  %v875_v11 = vadd.f32 %v1256_v5, %v810_v61  ;;  %v206_v23 = vpop.permute.xlu0 %205 }
  0xf3   :  { %v1220_v25 = vpop.f32.mrf.mxu0  ;;  %v1259_v21 = vadd.f32 %v1258_v24, %v1752_v22 }
  0xf4   :  { %v1754_v26 = vpop.f32.mrf.mxu1  ;;  %v813_v12 = vadd.f32 %v1219_v62, %v201_v1 }
  0xf5   :  { %v1221_v27 = vpop.f32.mrf.mxu0 }
  0xf6   :  { %v1756_v28 = vpop.f32.mrf.mxu1  ;;  %v1222_v14 = vadd.f32 %v1221_v27, %v1220_v25  ;;  %v878_v44 = vadd.f32 %v1259_v21, %v813_v12  ;;  %v216_v57 = vpop.permute.xlu0 %215 }
  0xf7   :  { %v1758_v29 = vpop.f32.mrf.mxu0  ;;  %v1262_v50 = vadd.f32 %v1756_v28, %v1754_v26 }
  0xf8   :  { %v1760_v30 = vpop.f32.mrf.mxu1  ;;  %v818_v45 = vadd.f32 %v1222_v14, %v206_v23 }
  0xf9   :  { %v1762_v31 = vpop.f32.mrf.mxu0 }
  0xfa   :  { %v1764_v32 = vpop.f32.mrf.mxu1  ;;  %v1225_v25 = vadd.f32 %v1762_v31, %v1758_v29 }
  0xfb   :  { %v1766_v33 = vpop.f32.mrf.mxu0  ;;  %v1265_v28 = vadd.f32 %v1764_v32, %v1760_v30 }
  0xfc   :  { %v1768_v34 = vpop.f32.mrf.mxu1 }
  0xfd   :  { %v1770_v35 = vpop.f32.mrf.mxu0 }
  0xfe   :  { %v1772_v37 = vpop.f32.mrf.mxu1 }
  0xff   :  { %v1774_v39 = vpop.f32.mrf.mxu0  ;;  %v1268_v32 = vadd.f32 %v1772_v37, %v1768_v34 }
 0x100   :  { %v1776_v40 = vpop.f32.mrf.mxu1 }
 0x101   :  { %v1778_v41 = vpop.f32.mrf.mxu0 }
 0x102   :  { %v1780_v42 = vpop.f32.mrf.mxu1 }
 0x103   :  { %v1288_v46 = vpop.f32.mrf.mxu0  ;;  %v1271_v34 = vadd.f32 %v1780_v42, %v1776_v40 }
 0x104   :  { %v1328_v49 = vpop.f32.mrf.mxu1 }
 0x105   :  { %v1289_v51 = vpop.f32.mrf.mxu0 }
 0x106   :  { %v1290_v54 = vadd.f32 %v1289_v51, %v1288_v46  ;;  %v1329_v55 = vpop.f32.mrf.mxu1  ;;  %v211_v46 = vpop.permute.xlu1 %210 }
 0x107   :  { %v1291_v56 = vpop.f32.mrf.mxu0  ;;  %v1330_v59 = vadd.f32 %v1329_v55, %v1328_v49  ;;  %v821_v31 = vadd.f32 %v1225_v25, %v211_v46 }
 0x108   :  { %v932_v58 = vadd.f32 %v1290_v54, %v867_v52  ;;  %v1331_v60 = vpop.f32.mrf.mxu1  ;;  %v1228_v54 = vadd.f32 %v1770_v35, %v1766_v33 }
 0x109   :  { %v1292_v63 = vpop.f32.mrf.mxu0  ;;  %v886_v35 = vadd.f32 %v1265_v28, %v821_v31 }
 0x10a   :  { %v997_v2 = vadd.f32 %v1330_v59, %v932_v58  ;;  %v1293_v3 = vadd.f32 %v1292_v63, %v1291_v56  ;;  %v1332_v4 = vpop.f32.mrf.mxu1  ;;  %v883_v56 = vadd.f32 %v1262_v50, %v818_v45  ;;  %v826_v1 = vadd.f32 %v1228_v54, %v216_v57 }
 0x10b   :  { %v1294_v6 = vpop.f32.mrf.mxu0  ;;  %v1333_v9 = vadd.f32 %v1332_v4, %v1331_v60 }
 0x10c   :  { %v1027_v7 = vmax.f32 %v997_v2, 0.0  ;;  %v935_v8 = vadd.f32 %v1293_v3, %v870_v0  ;;  %v1334_v10 = vpop.f32.mrf.mxu1  ;;  %v1231_v3 = vadd.f32 %v1778_v41, %v1774_v39 }
 0x10d   :  { %v1295_v13 = vpop.f32.mrf.mxu0 }
 0x10e   :  { %v1184_v15 = vpack.c.bf16 %v1027_v7, %v1027_v7  ;;  %v1000_v16 = vadd.f32 %v1333_v9, %v935_v8  ;;  %v1296_v17 = vadd.f32 %v1295_v13, %v1294_v6  ;;  %v1335_v19 = vpop.f32.mrf.mxu1  ;;  %v221_v7 = vpop.permute.xlu1 %220  ;;  %v891_v13 = vadd.f32 %v1268_v32, %v826_v1 }
 0x10f   :  { %v1297_v36 = vpop.f32.mrf.mxu0  ;;  %v1336_v38 = vadd.f32 %v1335_v19, %v1334_v10  ;;  %v829_v41 = vadd.f32 %v1231_v3, %v221_v7 }
 0x110   :  { %1068 = vst.msk [vmem:[%s1832_s3] sm:$0xf] %vm1067_vm0, %v1184_v15  ;;  %v1028_v18 = vmax.f32 %v1000_v16, 0.0  ;;  %v940_v20 = vadd.f32 %v1296_v17, %v875_v11  ;;  %v1337_v43 = vpop.f32.mrf.mxu1 }
 0x111   :  { %v1298_v27 = vpop.f32.mrf.mxu0 }
 0x112   :  { %v1185_v47 = vpack.c.bf16 %v1028_v18, %v1028_v18  ;;  %v1005_v22 = vadd.f32 %v1336_v38, %v940_v20  ;;  %v1299_v24 = vadd.f32 %v1298_v27, %v1297_v36  ;;  %v1338_v48 = vpop.f32.mrf.mxu1  ;;  %v894_v20 = vadd.f32 %v1271_v34, %v829_v41 }
 0x113   :  { %v1300_v49 = vpop.f32.mrf.mxu0  ;;  %v1339_v53 = vadd.f32 %v1338_v48, %v1337_v43 }
 0x114   :  { %1069 = vst.msk [vmem:[%s1832_s3 + $0x4] sm:$0xf] %vm1067_vm0, %v1185_v47  ;;  %v1029_v51 = vmax.f32 %v1005_v22, 0.0  ;;  %v943_v52 = vadd.f32 %v1299_v24, %v878_v44  ;;  %v1340_v29 = vpop.f32.mrf.mxu1 }
 0x115   :  { %v1301_v55 = vpop.f32.mrf.mxu0 }
 0x116   :  { %v1186_v58 = vpack.c.bf16 %v1029_v51, %v1029_v51  ;;  %v1008_v59 = vadd.f32 %v1339_v53, %v943_v52  ;;  %v1302_v60 = vadd.f32 %v1301_v55, %v1300_v49  ;;  %v1341_v26 = vpop.f32.mrf.mxu1 }
 0x117   :  { %v1303_v61 = vpop.f32.mrf.mxu0  ;;  %v1342_v0 = vadd.f32 %v1341_v26, %v1340_v29 }
 0x118   :  { %1070 = vst.msk [vmem:[%s1832_s3 + $0x8] sm:$0xf] %vm1067_vm0, %v1186_v58  ;;  %v1030_v62 = vmax.f32 %v1008_v59, 0.0  ;;  %v948_v63 = vadd.f32 %v1302_v60, %v883_v56  ;;  %v1343_v33 = vpop.f32.mrf.mxu1 }
 0x119   :  { %v1304_v2 = vpop.f32.mrf.mxu0 }
 0x11a   :  { %v1187_v4 = vpack.c.bf16 %v1030_v62, %v1030_v62  ;;  %v1013_v5 = vadd.f32 %v1342_v0, %v948_v63  ;;  %v1305_v6 = vadd.f32 %v1304_v2, %v1303_v61  ;;  %v1344_v30 = vpop.f32.mrf.mxu1 }
 0x11b   :  { %v1306_v8 = vpop.f32.mrf.mxu0  ;;  %v1345_v11 = vadd.f32 %v1344_v30, %v1343_v33 }
 0x11c   :  { %1071 = vst.msk [vmem:[%s1832_s3 + $0xc] sm:$0xf] %vm1067_vm0, %v1187_v4  ;;  %v1031_v9 = vmax.f32 %v1013_v5, 0.0  ;;  %v951_v10 = vadd.f32 %v1305_v6, %v886_v35  ;;  %v1346_v12 = vpop.f32.mrf.mxu1 }
 0x11d   :  { %v1307_v39 = vpop.f32.mrf.mxu0 }
 0x11e   :  { %v1188_v14 = vpack.c.bf16 %v1031_v9, %v1031_v9  ;;  %v1016_v15 = vadd.f32 %v1345_v11, %v951_v10  ;;  %v1308_v16 = vadd.f32 %v1307_v39, %v1306_v8  ;;  %v1347_v17 = vpop.f32.mrf.mxu1 }
 0x11f   :  { %v1309_v19 = vpop.f32.mrf.mxu0  ;;  %v1348_v23 = vadd.f32 %v1347_v17, %v1346_v12 }
 0x120   :  { %1072 = vst.msk [vmem:[%s1832_s3 + $0x10] sm:$0xf] %vm1067_vm0, %v1188_v14  ;;  %v1032_v37 = vmax.f32 %v1016_v15, 0.0  ;;  %v956_v21 = vadd.f32 %v1308_v16, %v891_v13  ;;  %v1349_v36 = vpop.f32.mrf.mxu1 }
 0x121   :  { %v1310_v18 = vpop.f32.mrf.mxu0 }
 0x122   :  { %v1189_v38 = vpack.c.bf16 %v1032_v37, %v1032_v37  ;;  %v1021_v43 = vadd.f32 %v1348_v23, %v956_v21  ;;  %v1311_v44 = vadd.f32 %v1310_v18, %v1309_v19  ;;  %v1350_v25 = vpop.f32.mrf.mxu1 }
 0x123   :  { %v1351_v27 = vadd.f32 %v1350_v25, %v1349_v36 }
 0x124   :  { %1073 = vst.msk [vmem:[%s1832_s3 + $0x14] sm:$0xf] %vm1067_vm0, %v1189_v38  ;;  %v1033_v40 = vmax.f32 %v1021_v43, 0.0  ;;  %v959_v42 = vadd.f32 %v1311_v44, %v894_v20 }
 0x126   :  { %v1190_v45 = vpack.c.bf16 %v1033_v40, %v1033_v40  ;;  %v1024_v46 = vadd.f32 %v1351_v27, %v959_v42 }
 0x128   :  { %1074 = vst.msk [vmem:[%s1832_s3 + $0x18] sm:$0xf] %vm1067_vm0, %v1190_v45  ;;  %v1034_v47 = vmax.f32 %v1024_v46, 0.0 }
 0x12a   :  { %v1191_v22 = vpack.c.bf16 %v1034_v47, %v1034_v47 }
 0x12c   :  { %1075 = vst.msk [vmem:[%s1832_s3 + $0x1c] sm:$0xf] %vm1067_vm0, %v1191_v22 }

// kernel: conv_encoder_forward.9
= control target key start
LH: loop header
LB: loop body
LE: loop exit
PB: predicated region body
PF: predicated region fallthrough
CT: control target
= control target key end

     0   :  { %v152_v36 = vlaneseq  ;;  %v1586_v37 = vmov 1966171168   ;;  %vm1203_vm0 = vcmask 123904   ;;  %s2071_s1 = inlined_call_operand.vmem [shape: bf16[1024,256], index: 1, kind: input, shape index: {}]   ;;  %s2072_s0 = inlined_call_operand.vmem [shape: bf16[2,1024], index: 0, kind: input, shape index: {}]   ;;  %s2073_s3 = inlined_call_operand.vmem [shape: bf16[256,16], index: 3, kind: input, shape index: {}]   ;;  %s2074_s2 = inlined_call_operand.vmem [shape: f32[1,256], index: 2, kind: input, shape index: {}]   ;;  %s2075_s4 = inlined_call_operand.vmem [shape: f32[1,16], index: 4, kind: input, shape index: {}]   ;;  %s2076_s5 = inlined_call_operand.vmem [shape: f32[2,16], index: 5, kind: output, shape index: {}]  }
   0x1   :  { %v1377_v0 = vld [vmem:[%s2071_s1 + $0x74] ss:$8 sps:$4 sm:$0xff]   ;;  %v1381_v2 = vld [vmem:[%s2071_s1 + $0x70] ss:$8 sps:$4 sm:$0xff]   ;;  %v1383_v4 = vld [vmem:[%s2071_s1 + $0x64] ss:$8 sps:$4 sm:$0xff]   ;;  %v165_v38 = vunpack.c.l.s4 %v1586_v37 }
   0x2   :  { %v1379_v1 = vld [vmem:[%s2071_s1 + $0x174] ss:$8 sps:$4 sm:$0xff]   ;;  %860 = vmatprep.subr.bf16.mxu0 %v1377_v0  ;;  %v1382_v3 = vld [vmem:[%s2071_s1 + $0x170] ss:$8 sps:$4 sm:$0xff]   ;;  %v1385_v5 = vld [vmem:[%s2071_s1 + $0x164] ss:$8 sps:$4 sm:$0xff]  }
   0x3   :  { %901 = vmatprep.subr.bf16.mxu1 %v1379_v1  ;;  %861 = vmatpush1.bf16.msra.mxu0 %v1381_v2  ;;  %v1387_v6 = vld [vmem:[%s2071_s1 + $0x60] ss:$8 sps:$4 sm:$0xff]   ;;  %v1389_v8 = vld [vmem:[%s2071_s1 + $0x54] ss:$8 sps:$4 sm:$0xff]   ;;  %v1393_v10 = vld [vmem:[%s2071_s1 + $0x50] ss:$8 sps:$4 sm:$0xff]   ;;  %v166_v43 = vunpack.c.0.s8 %v165_v38 }
   0x4   :  { %902 = vmatpush1.bf16.msra.mxu1 %v1382_v3  ;;  %862 = vmatprep.subr.bf16.mxu0 %v1383_v4  ;;  %v1388_v7 = vld [vmem:[%s2071_s1 + $0x160] ss:$8 sps:$4 sm:$0xff]   ;;  %v1391_v9 = vld [vmem:[%s2071_s1 + $0x154] ss:$8 sps:$4 sm:$0xff]   ;;  %v1394_v11 = vld [vmem:[%s2071_s1 + $0x150] ss:$8 sps:$4 sm:$0xff]  }
   0x5   :  { %903 = vmatprep.subr.bf16.mxu1 %v1385_v5  ;;  %v1395_v12 = vld [vmem:[%s2071_s1 + $0x44] ss:$8 sps:$4 sm:$0xff]   ;;  %v1399_v14 = vld [vmem:[%s2071_s1 + $0x40] ss:$8 sps:$4 sm:$0xff]   ;;  %v1401_v16 = vld [vmem:[%s2071_s1 + $0x34] ss:$8 sps:$4 sm:$0xff]  }
   0x6   :  { %v1397_v13 = vld [vmem:[%s2071_s1 + $0x144] ss:$8 sps:$4 sm:$0xff]   ;;  %v1400_v15 = vld [vmem:[%s2071_s1 + $0x140] ss:$8 sps:$4 sm:$0xff]   ;;  %v1403_v17 = vld [vmem:[%s2071_s1 + $0x134] ss:$8 sps:$4 sm:$0xff]  }
   0x7   :  { %863 = vmatpush1.bf16.msra.mxu0 %v1387_v6  ;;  %v1405_v18 = vld [vmem:[%s2071_s1 + $0x30] ss:$8 sps:$4 sm:$0xff]   ;;  %v1407_v20 = vld [vmem:[%s2071_s1 + $0x24] ss:$8 sps:$4 sm:$0xff]   ;;  %v1411_v22 = vld [vmem:[%s2071_s1 + $0x20] ss:$8 sps:$4 sm:$0xff]  }
   0x8   :  { %904 = vmatpush1.bf16.msra.mxu1 %v1388_v7  ;;  %864 = vmatprep.subr.bf16.mxu0 %v1389_v8  ;;  %v1406_v19 = vld [vmem:[%s2071_s1 + $0x130] ss:$8 sps:$4 sm:$0xff]   ;;  %v1409_v21 = vld [vmem:[%s2071_s1 + $0x124] ss:$8 sps:$4 sm:$0xff]   ;;  %v1412_v23 = vld [vmem:[%s2071_s1 + $0x120] ss:$8 sps:$4 sm:$0xff]  }
   0x9   :  { %905 = vmatprep.subr.bf16.mxu1 %v1391_v9  ;;  %v1413_v24 = vld [vmem:[%s2071_s1 + $0x14] ss:$8 sps:$4 sm:$0xff]   ;;  %v1417_v26 = vld [vmem:[%s2071_s1 + $0x10] ss:$8 sps:$4 sm:$0xff]   ;;  %v1419_v28 = vld [vmem:[%s2071_s1 + $0x4] ss:$8 sps:$4 sm:$0xff]  }
   0xa   :  { %v1415_v25 = vld [vmem:[%s2071_s1 + $0x114] ss:$8 sps:$4 sm:$0xff]   ;;  %v1418_v27 = vld [vmem:[%s2071_s1 + $0x110] ss:$8 sps:$4 sm:$0xff]   ;;  %v1421_v29 = vld [vmem:[%s2071_s1 + $0x104] ss:$8 sps:$4 sm:$0xff]  }
   0xb   :  { %865 = vmatpush1.bf16.msra.mxu0 %v1393_v10  ;;  %v1423_v30 = vld [vmem:[%s2071_s1] ss:$8 sps:$4 sm:$0xff]   ;;  %v1425_v32 = vld [vmem:[%s2071_s1 + $0xf4] ss:$8 sps:$4 sm:$0xff]   ;;  %v1429_v34 = vld [vmem:[%s2071_s1 + $0xf0] ss:$8 sps:$4 sm:$0xff]  }
   0xc   :  { %906 = vmatpush1.bf16.msra.mxu1 %v1394_v11  ;;  %866 = vmatprep.subr.bf16.mxu0 %v1395_v12  ;;  %v1424_v31 = vld [vmem:[%s2071_s1 + $0x100] ss:$8 sps:$4 sm:$0xff]   ;;  %v1427_v33 = vld [vmem:[%s2071_s1 + $0x1f4] ss:$8 sps:$4 sm:$0xff]   ;;  %v1430_v35 = vld [vmem:[%s2071_s1 + $0x1f0] ss:$8 sps:$4 sm:$0xff]  }
   0xd   :  { %907 = vmatprep.subr.bf16.mxu1 %v1397_v13  ;;  %v1431_v39 = vld [vmem:[%s2071_s1 + $0xe4] ss:$8 sps:$4 sm:$0xff]   ;;  %v1435_v41 = vld [vmem:[%s2071_s1 + $0xe0] ss:$8 sps:$4 sm:$0xff]   ;;  %v1734_v42 = vshrl.u32 %v152_v36, 7 }
   0xe   :  { %v1433_v40 = vld [vmem:[%s2071_s1 + $0x1e4] ss:$8 sps:$4 sm:$0xff]   ;;  %v1436_v44 = vld [vmem:[%s2071_s1 + $0x1e0] ss:$8 sps:$4 sm:$0xff]   ;;  %v1437_v45 = vld [vmem:[%s2071_s1 + $0xd4] ss:$8 sps:$4 sm:$0xff]  }
   0xf   :  { %867 = vmatpush1.bf16.msra.mxu0 %v1399_v14  ;;  %v1439_v46 = vld [vmem:[%s2071_s1 + $0x1d4] ss:$8 sps:$4 sm:$0xff]   ;;  %v1441_v47 = vld [vmem:[%s2071_s1 + $0xd0] ss:$8 sps:$4 sm:$0xff]   ;;  %v169_v49 = vsub.s32 %v166_v43, %v1734_v42  ;;  %v1443_v50 = vld [vmem:[%s2071_s1 + $0xc4] ss:$8 sps:$4 sm:$0xff]  }
  0x10   :  { %908 = vmatpush1.bf16.msra.mxu1 %v1400_v15  ;;  %868 = vmatprep.subr.bf16.mxu0 %v1401_v16  ;;  %v1442_v48 = vld [vmem:[%s2071_s1 + $0x1d0] ss:$8 sps:$4 sm:$0xff]   ;;  %v1445_v51 = vld [vmem:[%s2071_s1 + $0x1c4] ss:$8 sps:$4 sm:$0xff]   ;;  %v1447_v53 = vld [vmem:[%s2071_s1 + $0xc0] ss:$8 sps:$4 sm:$0xff]  }
  0x11   :  { %909 = vmatprep.subr.bf16.mxu1 %v1403_v17  ;;  %v21_v52 = vld [vmem:[%s2072_s0] sm:$0xff]  ;;  %v1449_v57 = vld [vmem:[%s2071_s1 + $0xb4] ss:$8 sps:$4 sm:$0xff]   ;;  %v1453_v61 = vld [vmem:[%s2071_s1 + $0xb0] ss:$8 sps:$4 sm:$0xff]  }
  0x12   :  { %v163_v54 = vcombine.high %v21_v52, %v21_v52  ;;  %v170_v55 = vrot.slane %v21_v52, %v169_v49  ;;  %v1448_v56 = vld [vmem:[%s2071_s1 + $0x1c0] ss:$8 sps:$4 sm:$0xff]   ;;  %v1451_v58 = vld [vmem:[%s2071_s1 + $0x1b4] ss:$8 sps:$4 sm:$0xff]   ;;  %v1454_v0 = vld [vmem:[%s2071_s1 + $0x1b0] ss:$8 sps:$4 sm:$0xff]  }
  0x13   :  { %869 = vmatpush1.bf16.msra.mxu0 %v1405_v18  ;;  %v1455_v1 = vld [vmem:[%s2071_s1 + $0xa4] ss:$8 sps:$4 sm:$0xff]   ;;  %v1459_v4 = vld [vmem:[%s2071_s1 + $0xa0] ss:$8 sps:$4 sm:$0xff]   ;;  %v1461_v6 = vld [vmem:[%s2071_s1 + $0x94] ss:$8 sps:$4 sm:$0xff]  }
  0x14   :  { %910 = vmatpush1.bf16.msra.mxu1 %v1406_v19  ;;  %870 = vmatprep.subr.bf16.mxu0 %v1407_v20  ;;  %v178_v59 = vcombine.high %v170_v55, %v170_v55  ;;  %v177_v60 = vrot.slane %v163_v54, %v169_v49  ;;  %v1457_v2 = vld [vmem:[%s2071_s1 + $0x1a4] ss:$8 sps:$4 sm:$0xff]   ;;  %v1460_v5 = vld [vmem:[%s2071_s1 + $0x1a0] ss:$8 sps:$4 sm:$0xff]   ;;  %v1463_v7 = vld [vmem:[%s2071_s1 + $0x194] ss:$8 sps:$4 sm:$0xff]   ;;  %v186_v14 = vrot.slane %v170_v55, %v169_v49 }
  0x15   :  { %911 = vmatprep.subr.bf16.mxu1 %v1409_v21  ;;  %v1465_v8 = vld [vmem:[%s2071_s1 + $0x90] ss:$8 sps:$4 sm:$0xff]   ;;  %v1467_v10 = vld [vmem:[%s2071_s1 + $0x84] ss:$8 sps:$4 sm:$0xff]   ;;  %v1471_v13 = vld [vmem:[%s2071_s1 + $0x80] ss:$8 sps:$4 sm:$0xff]  }
  0x16   :  { %v200_v62 = vrot.slane %v178_v59, %v169_v49  ;;  %v1776_v63 = vrot.slane %v177_v60, %v169_v49  ;;  %v1466_v9 = vld [vmem:[%s2071_s1 + $0x190] ss:$8 sps:$4 sm:$0xff]   ;;  %v1469_v11 = vld [vmem:[%s2071_s1 + $0x184] ss:$8 sps:$4 sm:$0xff]   ;;  %v179_v12 = vcombine.high %v177_v60, %v177_v60  ;;  %v1472_v15 = vld [vmem:[%s2071_s1 + $0x180] ss:$8 sps:$4 sm:$0xff]   ;;  %v208_v19 = vcombine.high %v186_v14, %v186_v14 }
  0x17   :  { %871 = vmatpush1.bf16.msra.mxu0 %v1411_v22  ;;  %v1476_v16 = vld [vmem:[%s2071_s1 + $0x274] ss:$8 sps:$4 sm:$0xff]   ;;  %v1474_v20 = vld [vmem:[%s2071_s1 + $0x270] ss:$8 sps:$4 sm:$0xff]   ;;  %v1482_v22 = vld [vmem:[%s2071_s1 + $0x264] ss:$8 sps:$4 sm:$0xff]  }
  0x18   :  { %912 = vmatpush1.bf16.msra.mxu1 %v1412_v23  ;;  %872 = vmatprep.subr.bf16.mxu0 %v1413_v24  ;;  %v210_v3 = vcombine.high %v200_v62, %v200_v62  ;;  %v1479_v17 = vld [vmem:[%s2071_s1 + $0x374] ss:$8 sps:$4 sm:$0xff]   ;;  %v207_v18 = vrot.slane %v179_v12, %v169_v49  ;;  %v1477_v21 = vld [vmem:[%s2071_s1 + $0x370] ss:$8 sps:$4 sm:$0xff]   ;;  %v1485_v23 = vld [vmem:[%s2071_s1 + $0x364] ss:$8 sps:$4 sm:$0xff]  }
  0x19   :  { %913 = vmatprep.subr.bf16.mxu1 %v1415_v25  ;;  %892 = vmatprep.mubr.bf16.mxu0 %v200_v62  ;;  %v1480_v25 = vld [vmem:[%s2071_s1 + $0x260] ss:$8 sps:$4 sm:$0xff]   ;;  %v1503_v36 = vld [vmem:[%s2071_s1 + $0x334] ss:$8 sps:$4 sm:$0xff]   ;;  %v1498_v37 = vld [vmem:[%s2071_s1 + $0x230] ss:$8 sps:$4 sm:$0xff]  }
  0x1a   :  { %933 = vmatprep.mubr.bf16.mxu1 %v210_v3  ;;  %v211_v24 = vcombine.high %v207_v18, %v207_v18  ;;  %v1501_v38 = vld [vmem:[%s2071_s1 + $0x330] ss:$8 sps:$4 sm:$0xff]   ;;  %v1507_v43 = vld [vmem:[%s2071_s1 + $0x320] ss:$8 sps:$4 sm:$0xff]   ;;  %v1521_v49 = vld [vmem:[%s2071_s1 + $0x304] ss:$8 sps:$4 sm:$0xff]  }
  0x1b   :  { %873 = vmatpush1.bf16.msra.mxu0 %v1417_v26  ;;  %v1483_v26 = vld [vmem:[%s2071_s1 + $0x360] ss:$8 sps:$4 sm:$0xff]   ;;  %v1524_v52 = vld [vmem:[%s2071_s1 + $0x2f4] ss:$8 sps:$4 sm:$0xff]   ;;  %v1522_v54 = vld [vmem:[%s2071_s1 + $0x2f0] ss:$8 sps:$4 sm:$0xff]  }
  0x1c   :  { %914 = vmatpush1.bf16.msra.mxu1 %v1418_v27  ;;  %874 = vmatprep.subr.bf16.mxu0 %v1419_v28  ;;  %v1488_v27 = vld [vmem:[%s2071_s1 + $0x254] ss:$8 sps:$4 sm:$0xff]   ;;  %v1525_v55 = vld [vmem:[%s2071_s1 + $0x3f0] ss:$8 sps:$4 sm:$0xff]   ;;  %v1531_v59 = vld [vmem:[%s2071_s1 + $0x3e0] ss:$8 sps:$4 sm:$0xff]  }
  0x1d   :  { %915 = vmatprep.subr.bf16.mxu1 %v1421_v29  ;;  %v1491_v28 = vld [vmem:[%s2071_s1 + $0x354] ss:$8 sps:$4 sm:$0xff]   ;;  %v1486_v29 = vld [vmem:[%s2071_s1 + $0x250] ss:$8 sps:$4 sm:$0xff]   ;;  %v1540_v3 = vld [vmem:[%s2071_s1 + $0x2c0] ss:$8 sps:$4 sm:$0xff]  }
  0x1e   :  { %v1536_v60 = vld [vmem:[%s2071_s1 + $0x2d4] ss:$8 sps:$4 sm:$0xff]   ;;  %v1534_v62 = vld [vmem:[%s2071_s1 + $0x2d0] ss:$8 sps:$4 sm:$0xff]   ;;  %v1555_v12 = vld [vmem:[%s2071_s1 + $0x3a0] ss:$8 sps:$4 sm:$0xff]  }
  0x1f   :  { %875 = vmatpush1.bf16.msra.mxu0 %v1423_v30  ;;  %v1489_v30 = vld [vmem:[%s2071_s1 + $0x350] ss:$8 sps:$4 sm:$0xff]  }
  0x20   :  { %916 = vmatpush1.bf16.msra.mxu1 %v1424_v31  ;;  %876 = vmatprep.subr.bf16.mxu0 %v1425_v32  ;;  %v1494_v31 = vld [vmem:[%s2071_s1 + $0x244] ss:$8 sps:$4 sm:$0xff]  }
  0x21   :  { %917 = vmatprep.subr.bf16.mxu1 %v1427_v33  ;;  %v1497_v32 = vld [vmem:[%s2071_s1 + $0x344] ss:$8 sps:$4 sm:$0xff]   ;;  %v1492_v33 = vld [vmem:[%s2071_s1 + $0x240] ss:$8 sps:$4 sm:$0xff]  }
  0x23   :  { %877 = vmatpush2.bf16.msra.mxu0 %v1429_v34  ;;  %v1495_v34 = vld [vmem:[%s2071_s1 + $0x340] ss:$8 sps:$4 sm:$0xff]  }
  0x24   :  { %918 = vmatpush2.bf16.msra.mxu1 %v1430_v35  ;;  %878 = vmatprep.subr.bf16.mxu0 %v1431_v39  ;;  %v1500_v35 = vld [vmem:[%s2071_s1 + $0x234] ss:$8 sps:$4 sm:$0xff]   ;;  %v1506_v39 = vld [vmem:[%s2071_s1 + $0x224] ss:$8 sps:$4 sm:$0xff]  }
  0x25   :  { %919 = vmatprep.subr.bf16.mxu1 %v1433_v40  ;;  %v1509_v40 = vld [vmem:[%s2071_s1 + $0x324] ss:$8 sps:$4 sm:$0xff]  }
  0x27   :  { %879 = vmatpush2.bf16.msra.mxu0 %v1435_v41  ;;  %v1504_v41 = vld [vmem:[%s2071_s1 + $0x220] ss:$8 sps:$4 sm:$0xff]  }
  0x28   :  { %920 = vmatpush2.bf16.msra.mxu1 %v1436_v44  ;;  %880 = vmatprep.subr.bf16.mxu0 %v1437_v45  ;;  %v1512_v44 = vld [vmem:[%s2071_s1 + $0x214] ss:$8 sps:$4 sm:$0xff]  }
  0x29   :  { %921 = vmatprep.subr.bf16.mxu1 %v1439_v46  ;;  %v1515_v45 = vld [vmem:[%s2071_s1 + $0x314] ss:$8 sps:$4 sm:$0xff]   ;;  %v1510_v46 = vld [vmem:[%s2071_s1 + $0x210] ss:$8 sps:$4 sm:$0xff]  }
  0x2b   :  { %881 = vmatpush2.bf16.msra.mxu0 %v1441_v47  ;;  %v1513_v47 = vld [vmem:[%s2071_s1 + $0x310] ss:$8 sps:$4 sm:$0xff]  }
  0x2c   :  { %922 = vmatpush2.bf16.msra.mxu1 %v1442_v48  ;;  %882 = vmatprep.subr.bf16.mxu0 %v1443_v50  ;;  %v1518_v48 = vld [vmem:[%s2071_s1 + $0x204] ss:$8 sps:$4 sm:$0xff]   ;;  %v1516_v50 = vld [vmem:[%s2071_s1 + $0x200] ss:$8 sps:$4 sm:$0xff]  }
  0x2d   :  { %923 = vmatprep.subr.bf16.mxu1 %v1445_v51  ;;  %v1519_v51 = vld [vmem:[%s2071_s1 + $0x300] ss:$8 sps:$4 sm:$0xff]  }
  0x2f   :  { %883 = vmatpush2.bf16.msra.mxu0 %v1447_v53  ;;  %v1527_v53 = vld [vmem:[%s2071_s1 + $0x3f4] ss:$8 sps:$4 sm:$0xff]  }
  0x30   :  { %924 = vmatpush2.bf16.msra.mxu1 %v1448_v56  ;;  %884 = vmatprep.subr.bf16.mxu0 %v1449_v57  ;;  %v1530_v56 = vld [vmem:[%s2071_s1 + $0x2e4] ss:$8 sps:$4 sm:$0xff]  }
  0x31   :  { %925 = vmatprep.subr.bf16.mxu1 %v1451_v58  ;;  %v1533_v57 = vld [vmem:[%s2071_s1 + $0x3e4] ss:$8 sps:$4 sm:$0xff]   ;;  %v1528_v58 = vld [vmem:[%s2071_s1 + $0x2e0] ss:$8 sps:$4 sm:$0xff]  }
  0x33   :  { %885 = vmatpush2.bf16.msra.mxu0 %v1453_v61  ;;  %v1539_v61 = vld [vmem:[%s2071_s1 + $0x3d4] ss:$8 sps:$4 sm:$0xff]  }
  0x34   :  { %926 = vmatpush2.bf16.msra.mxu1 %v1454_v0  ;;  %886 = vmatprep.subr.bf16.mxu0 %v1455_v1  ;;  %v1537_v0 = vld [vmem:[%s2071_s1 + $0x3d0] ss:$8 sps:$4 sm:$0xff]   ;;  %v1542_v1 = vld [vmem:[%s2071_s1 + $0x2c4] ss:$8 sps:$4 sm:$0xff]  }
  0x35   :  { %927 = vmatprep.subr.bf16.mxu1 %v1457_v2  ;;  %v1545_v2 = vld [vmem:[%s2071_s1 + $0x3c4] ss:$8 sps:$4 sm:$0xff]  }
  0x37   :  { %887 = vmatpush2.bf16.msra.mxu0 %v1459_v4  ;;  %v1543_v4 = vld [vmem:[%s2071_s1 + $0x3c0] ss:$8 sps:$4 sm:$0xff]  }
  0x38   :  { %928 = vmatpush2.bf16.msra.mxu1 %v1460_v5  ;;  %888 = vmatprep.subr.bf16.mxu0 %v1461_v6  ;;  %v1548_v5 = vld [vmem:[%s2071_s1 + $0x2b4] ss:$8 sps:$4 sm:$0xff]  }
  0x39   :  { %929 = vmatprep.subr.bf16.mxu1 %v1463_v7  ;;  %v1551_v6 = vld [vmem:[%s2071_s1 + $0x3b4] ss:$8 sps:$4 sm:$0xff]   ;;  %v1546_v7 = vld [vmem:[%s2071_s1 + $0x2b0] ss:$8 sps:$4 sm:$0xff]  }
  0x3b   :  { %889 = vmatpush2.bf16.msra.mxu0 %v1465_v8  ;;  %v1549_v8 = vld [vmem:[%s2071_s1 + $0x3b0] ss:$8 sps:$4 sm:$0xff]  }
  0x3c   :  { %930 = vmatpush2.bf16.msra.mxu1 %v1466_v9  ;;  %890 = vmatprep.subr.bf16.mxu0 %v1467_v10  ;;  %v1554_v9 = vld [vmem:[%s2071_s1 + $0x2a4] ss:$8 sps:$4 sm:$0xff]  }
  0x3d   :  { %931 = vmatprep.subr.bf16.mxu1 %v1469_v11  ;;  %v1557_v10 = vld [vmem:[%s2071_s1 + $0x3a4] ss:$8 sps:$4 sm:$0xff]   ;;  %v1552_v11 = vld [vmem:[%s2071_s1 + $0x2a0] ss:$8 sps:$4 sm:$0xff]  }
  0x3f   :  { %891 = vmatpush2.bf16.msra.mxu0 %v1471_v13  ;;  %v1560_v13 = vld [vmem:[%s2071_s1 + $0x294] ss:$8 sps:$4 sm:$0xff]  }
  0x40   :  { %932 = vmatpush2.bf16.msra.mxu1 %v1472_v15  ;;  %942 = vmatprep.subr.bf16.mxu0 %v1476_v16  ;;  %v1558_v15 = vld [vmem:[%s2071_s1 + $0x290] ss:$8 sps:$4 sm:$0xff]  }
  0x41   :  { %983 = vmatprep.subr.bf16.mxu1 %v1479_v17  ;;  %v1561_v16 = vld [vmem:[%s2071_s1 + $0x390] ss:$8 sps:$4 sm:$0xff]   ;;  %v1566_v17 = vld [vmem:[%s2071_s1 + $0x284] ss:$8 sps:$4 sm:$0xff]  }
  0x42   :  { %893 = vmatmul.mubr.bf16.vlgmr.msra.gmra.mxu0 %v186_v14  ;;  %v1563_v14 = vld [vmem:[%s2071_s1 + $0x394] ss:$8 sps:$4 sm:$0xff]  }
  0x43   :  { %934 = vmatmul.mubr.bf16.vlgmr.msra.gmra.mxu1 %v208_v19  ;;  %943 = vmatpush1.bf16.msra.mxu0 %v1474_v20  ;;  %v1564_v19 = vld [vmem:[%s2071_s1 + $0x280] ss:$8 sps:$4 sm:$0xff]  }
  0x44   :  { %984 = vmatpush1.bf16.msra.mxu1 %v1477_v21  ;;  %944 = vmatprep.subr.bf16.mxu0 %v1482_v22  ;;  %v1567_v20 = vld [vmem:[%s2071_s1 + $0x380] ss:$8 sps:$4 sm:$0xff]   ;;  %v209_v21 = vcombine.high %v1776_v63, %v1776_v63  ;;  %v1570_v22 = vld [vmem:[%s2073_s3 + $0x78] sm:$0xff]  }
  0x45   :  { %985 = vmatprep.subr.bf16.mxu1 %v1485_v23  ;;  %974 = vmatprep.mubr.bf16.mxu0 %v207_v18  ;;  %v1569_v18 = vld [vmem:[%s2071_s1 + $0x384] ss:$8 sps:$4 sm:$0xff]   ;;  %v1571_v23 = vld [vmem:[%s2073_s3 + $0x38] sm:$0xff]  }
  0x46   :  { %1015 = vmatprep.mubr.bf16.mxu1 %v211_v24  ;;  %v1572_v24 = vld [vmem:[%s2073_s3 + $0x70] sm:$0xff]  }
  0x47   :  { %945 = vmatpush1.bf16.msra.mxu0 %v1480_v25  ;;  %v1573_v25 = vld [vmem:[%s2073_s3 + $0x30] sm:$0xff]  }
  0x48   :  { %986 = vmatpush1.bf16.msra.mxu1 %v1483_v26  ;;  %946 = vmatprep.subr.bf16.mxu0 %v1488_v27  ;;  %v1575_v26 = vld [vmem:[%s2073_s3 + $0x28] sm:$0xff]   ;;  %v1576_v27 = vld [vmem:[%s2073_s3 + $0x60] sm:$0xff]  }
  0x49   :  { %987 = vmatprep.subr.bf16.mxu1 %v1491_v28  ;;  %v1577_v28 = vld [vmem:[%s2073_s3 + $0x20] sm:$0xff]  }
  0x4b   :  { %947 = vmatpush1.bf16.msra.mxu0 %v1486_v29  ;;  %v1578_v29 = vld [vmem:[%s2073_s3 + $0x58] sm:$0xff]  }
  0x4c   :  { %988 = vmatpush1.bf16.msra.mxu1 %v1489_v30  ;;  %948 = vmatprep.subr.bf16.mxu0 %v1494_v31  ;;  %v1579_v30 = vld [vmem:[%s2073_s3 + $0x18] sm:$0xff]   ;;  %v1580_v31 = vld [vmem:[%s2073_s3 + $0x50] sm:$0xff]  }
  0x4d   :  { %989 = vmatprep.subr.bf16.mxu1 %v1497_v32  ;;  %v1581_v32 = vld [vmem:[%s2073_s3 + $0x10] sm:$0xff]  }
  0x4f   :  { %949 = vmatpush1.bf16.msra.mxu0 %v1492_v33  ;;  %v1582_v33 = vld [vmem:[%s2073_s3 + $0x48] sm:$0xff]  }
  0x50   :  { %990 = vmatpush1.bf16.msra.mxu1 %v1495_v34  ;;  %950 = vmatprep.subr.bf16.mxu0 %v1500_v35  ;;  %v1583_v34 = vld [vmem:[%s2073_s3 + $0x8] sm:$0xff]   ;;  %v1584_v35 = vld [vmem:[%s2073_s3 + $0x40] sm:$0xff]  }
  0x51   :  { %991 = vmatprep.subr.bf16.mxu1 %v1503_v36  ;;  %v1585_v36 = vld [vmem:[%s2073_s3] sm:$0xff]  }
  0x53   :  { %951 = vmatpush1.bf16.msra.mxu0 %v1498_v37 }
  0x54   :  { %992 = vmatpush1.bf16.msra.mxu1 %v1501_v38  ;;  %952 = vmatprep.subr.bf16.mxu0 %v1506_v39 }
  0x55   :  { %993 = vmatprep.subr.bf16.mxu1 %v1509_v40 }
  0x57   :  { %953 = vmatpush1.bf16.msra.mxu0 %v1504_v41 }
  0x58   :  { %994 = vmatpush1.bf16.msra.mxu1 %v1507_v43  ;;  %954 = vmatprep.subr.bf16.mxu0 %v1512_v44 }
  0x59   :  { %995 = vmatprep.subr.bf16.mxu1 %v1515_v45 }
  0x5b   :  { %955 = vmatpush1.bf16.msra.mxu0 %v1510_v46  ;;  %v154_v46 = vsub.s32 0, %v1734_v42 }
  0x5c   :  { %996 = vmatpush1.bf16.msra.mxu1 %v1513_v47  ;;  %956 = vmatprep.subr.bf16.mxu0 %v1518_v48  ;;  %v150_v47 = vld [vmem:[%s2074_s2] sm:$0x3]  ;;  %v158_v48 = vsub.s32 1, %v1734_v42 }
  0x5d   :  { %997 = vmatprep.subr.bf16.mxu1 %v1521_v49  ;;  %v155_v49 = vrot.slane %v150_v47, %v154_v46 }
  0x5f   :  { %957 = vmatpush1.bf16.msra.mxu0 %v1516_v50  ;;  %v159_v50 = vrot.slane %v150_v47, %v158_v48 }
  0x60   :  { %998 = vmatpush1.bf16.msra.mxu1 %v1519_v51  ;;  %958 = vmatprep.subr.bf16.mxu0 %v1524_v52 }
  0x61   :  { %999 = vmatprep.subr.bf16.mxu1 %v1527_v53 }
  0x63   :  { %959 = vmatpush2.bf16.msra.mxu0 %v1522_v54 }
  0x64   :  { %1000 = vmatpush2.bf16.msra.mxu1 %v1525_v55  ;;  %960 = vmatprep.subr.bf16.mxu0 %v1530_v56 }
  0x65   :  { %1001 = vmatprep.subr.bf16.mxu1 %v1533_v57 }
  0x67   :  { %961 = vmatpush2.bf16.msra.mxu0 %v1528_v58 }
  0x68   :  { %1002 = vmatpush2.bf16.msra.mxu1 %v1531_v59  ;;  %962 = vmatprep.subr.bf16.mxu0 %v1536_v60 }
  0x69   :  { %1003 = vmatprep.subr.bf16.mxu1 %v1539_v61 }
  0x6b   :  { %963 = vmatpush2.bf16.msra.mxu0 %v1534_v62 }
  0x6c   :  { %1004 = vmatpush2.bf16.msra.mxu1 %v1537_v0  ;;  %964 = vmatprep.subr.bf16.mxu0 %v1542_v1 }
  0x6d   :  { %1005 = vmatprep.subr.bf16.mxu1 %v1545_v2 }
  0x6f   :  { %965 = vmatpush2.bf16.msra.mxu0 %v1540_v3 }
  0x70   :  { %1006 = vmatpush2.bf16.msra.mxu1 %v1543_v4  ;;  %966 = vmatprep.subr.bf16.mxu0 %v1548_v5 }
  0x71   :  { %1007 = vmatprep.subr.bf16.mxu1 %v1551_v6 }
  0x73   :  { %967 = vmatpush2.bf16.msra.mxu0 %v1546_v7 }
  0x74   :  { %1008 = vmatpush2.bf16.msra.mxu1 %v1549_v8  ;;  %968 = vmatprep.subr.bf16.mxu0 %v1554_v9  ;;  %v1337_v8 = vld [vmem:[%s2075_s4] ss:$0 sm:$0xff] }
  0x75   :  { %1009 = vmatprep.subr.bf16.mxu1 %v1557_v10 }
  0x77   :  { %969 = vmatpush2.bf16.msra.mxu0 %v1552_v11 }
  0x78   :  { %1010 = vmatpush2.bf16.msra.mxu1 %v1555_v12  ;;  %970 = vmatprep.subr.bf16.mxu0 %v1560_v13 }
  0x79   :  { %1011 = vmatprep.subr.bf16.mxu1 %v1563_v14 }
  0x7b   :  { %971 = vmatpush2.bf16.msra.mxu0 %v1558_v15 }
  0x7c   :  { %1012 = vmatpush2.bf16.msra.mxu1 %v1561_v16  ;;  %972 = vmatprep.subr.bf16.mxu0 %v1566_v17 }
  0x7d   :  { %1013 = vmatprep.subr.bf16.mxu1 %v1569_v18 }
  0x7f   :  { %973 = vmatpush2.bf16.msra.mxu0 %v1564_v19 }
  0x80   :  { %1014 = vmatpush2.bf16.msra.mxu1 %v1567_v20  ;;  %1354 = vmatprep.subr.bf16.mxu0 %v1570_v22 }
  0x82   :  { %975 = vmatmul.mubr.bf16.vlgmr.msra.gmra.mxu0 %v1776_v63  ;;  %v1574_v63 = vld [vmem:[%s2073_s3 + $0x68] sm:$0xff]  }
  0x83   :  { %1016 = vmatmul.mubr.bf16.vlgmr.msra.gmra.mxu1 %v209_v21  ;;  %1355 = vmatpush3.bf16.msra.mxu0 %v1571_v23 }
  0x84   :  { %1356 = vmatprep.subr.bf16.mxu0 %v1572_v24 }
  0x87   :  { %1357 = vmatpush3.bf16.msra.mxu0 %v1573_v25 }
  0x88   :  { %1358 = vmatprep.subr.bf16.mxu0 %v1574_v63 }
  0x8b   :  { %1359 = vmatpush3.bf16.msra.mxu0 %v1575_v26 }
  0x8c   :  { %1360 = vmatprep.subr.bf16.mxu0 %v1576_v27 }
  0x8f   :  { %1361 = vmatpush3.bf16.msra.mxu0 %v1577_v28 }
  0x90   :  { %1362 = vmatprep.subr.bf16.mxu0 %v1578_v29 }
  0x93   :  { %1363 = vmatpush3.bf16.msra.mxu0 %v1579_v30 }
  0x94   :  { %1364 = vmatprep.subr.bf16.mxu0 %v1580_v31 }
  0x97   :  { %1365 = vmatpush3.bf16.msra.mxu0 %v1581_v32 }
  0x98   :  { %1366 = vmatprep.subr.bf16.mxu0 %v1582_v33 }
  0x9b   :  { %1367 = vmatpush3.bf16.msra.mxu0 %v1583_v34 }
  0x9c   :  { %1368 = vmatprep.subr.bf16.mxu0 %v1584_v35 }
  0x9f   :  { %1369 = vmatpush3.bf16.msra.mxu0 %v1585_v36 }
 0x102   :  { %v894_v37 = vpop.f32.mrf.mxu0 }
 0x103   :  { %v935_v38 = vpop.f32.mrf.mxu1  ;;  %v895_v51 = vadd.f32 %v894_v37, %v155_v49 }
 0x104   :  { %v896_v39 = vpop.f32.mrf.mxu0 }
 0x105   :  { %v937_v40 = vpop.f32.mrf.mxu1  ;;  %v897_v52 = vadd.f32 %v896_v39, %v159_v50  ;;  %v936_v53 = vadd.f32 %v935_v38, %v895_v51 }
 0x106   :  { %v898_v41 = vpop.f32.mrf.mxu0 }
 0x107   :  { %v939_v43 = vpop.f32.mrf.mxu1  ;;  %v938_v56 = vadd.f32 %v937_v40, %v897_v52 }
 0x108   :  { %v899_v44 = vpop.f32.mrf.mxu0 }
 0x109   :  { %v940_v45 = vpop.f32.mrf.mxu1 }
 0x142   :  { %v976_v54 = vpop.f32.mrf.mxu0 }
 0x143   :  { %v1017_v55 = vpop.f32.mrf.mxu1  ;;  %v977_v57 = vadd.f32 %v976_v54, %v936_v53 }
 0x144   :  { %v978_v58 = vpop.f32.mrf.mxu0 }
 0x145   :  { %v1019_v59 = vpop.f32.mrf.mxu1  ;;  %v1018_v60 = vadd.f32 %v1017_v55, %v977_v57  ;;  %v979_v61 = vadd.f32 %v978_v58, %v938_v56 }
 0x146   :  { %v980_v62 = vpop.f32.mrf.mxu0 }
 0x147   :  { %v1021_v0 = vpop.f32.mrf.mxu1  ;;  %v1020_v1 = vadd.f32 %v1019_v59, %v979_v61  ;;  %v1024_v2 = vmax.f32 %v1018_v60, 0.0 }
 0x148   :  { %v981_v3 = vpop.f32.mrf.mxu0 }
 0x149   :  { %v1022_v4 = vpop.f32.mrf.mxu1  ;;  %v1025_v42 = vmax.f32 %v1020_v1, 0.0  ;;  %v1026_v6 = vpack.c.bf16 %v1024_v2, %v1024_v2 }
 0x14b   :  { %v1027_v5 = vpack.c.bf16 %v1025_v42, %v1025_v42 }
 0x14d   :  { %1195 = vmatprep.mubr.bf16.mxu0 %v1027_v5 }
 0x14e   :  { %1196 = vmatmul.mubr.bf16.vlgmr.msra.gmra.mxu0 %v1026_v6 }
 0x20e   :  { %v1370_v7 = vpop.f32.mrf.mxu0 }
 0x210   :  { %v1371_v9 = vpop.f32.mrf.mxu0 }
 0x211   :  { %v1372_v10 = vadd.f32 %v1371_v9, %v1370_v7 }
 0x212   :  { %v1373_v11 = vpop.f32.mrf.mxu0 }
 0x213   :  { %v1198_v12 = vadd.f32 %v1372_v10, %v1337_v8 }
 0x214   :  { %v1374_v13 = vpop.f32.mrf.mxu0 }
 0x215   :  { %1204 = vst.msk [vmem:[%s2076_s5] sm:$0x3] %vm1203_vm0, %v1198_v12 }

</bundles_post_ra>
